<compile_context>
chip_gen: v5e
topology: v5e:2x2
jax: 0.10.0
libtpu: 0.0.40
codegen_flags: <defaults>
</compile_context>

<pallas_src>
from functools import partial

import jax
import jax.numpy as jnp
from jax.experimental import pallas as pl
from jax.experimental.pallas import tpu as pltpu

NEG_SLOPE = 0.2
EPS = 1e-5


def _lrelu(v):
    return jnp.where(v >= 0, v, NEG_SLOPE * v)


def _cheb_t1(a_st, h):
    """T1 = -D^-1/2 A D^-1/2 h for one sample (ChebConv K=2, 'sym', lambda_max=2).

    a_st[s, t] is the dynamic weight of edge (s -> t) (Gram value, masked to the edge set,
    multi-edge counts included). Degree is the weighted out-degree at the source node
    (PyG's scatter_add over edge_index[0]); because gram is symmetric this is exactly the
    row-sum of a_st. The O(N^2*C) message matmul uses bf16 MXU operands with f32 accumulation;
    degrees / rsqrt stay f32."""
    deg = jnp.sum(a_st, axis=1, keepdims=True)                       # (N, 1), f32
    dinv = jnp.where(deg > 0.0, jax.lax.rsqrt(deg), 0.0)             # (N, 1), f32
    # TODO(synk): PyG yields NaN for a negative weighted degree (deg ** -0.5); guarded to 0 here
    #             (deg == 0 matches PyG, which masks inf -> 0).
    xs = (dinv * h).astype(jnp.bfloat16)                             # scale source rows
    msg = jax.lax.dot_general(a_st.astype(jnp.bfloat16), xs,
                              (((0,), (0,)), ((), ())),              # sum over sources -> (N, C)
                              preferred_element_type=jnp.float32)
    return -(dinv * msg)                                             # scale target rows


def stage1_kernel(x_ref, adj_ref, mod_ref, mlp_w_ref, gcn1_w_ref, vec_ref,
                  z1_ref, ast_ref):
    """Per-sample: fc1..fc4 (+AdaIN) -> gram edge weights -> ChebConv-1 (pre-BatchNorm)."""
    h = x_ref[0]                                    # (N, C_PAD)
    mod = mod_ref[0]                                # (8, C_PAD): rows 0..3 gamma, 4..7 beta
    vec = vec_ref[...]                              # (8, C_PAD): rows 0..3 fc bias, row 4 gcn1 bias

    # fc1..fc4: Linear -> style-conditioned InstanceNorm (per sample, over nodes) -> LeakyReLU
    for i in range(4):
        z = jnp.dot(h, mlp_w_ref[i], preferred_element_type=jnp.float32) + vec[i:i + 1]
        mean = jnp.mean(z, axis=0, keepdims=True)
        var = jnp.mean(jnp.square(z - mean), axis=0, keepdims=True)   # centered two-pass variance
        zn = (z - mean) * jax.lax.rsqrt(var + EPS)
        h = _lrelu(mod[i:i + 1] * zn + mod[4 + i:5 + i])

    # dynamic edge weights: per-sample gram (bf16 MXU operands, f32 accumulation), masked edges
    hb = h.astype(jnp.bfloat16)
    gram = jax.lax.dot_general(hb, hb, (((1,), (1,)), ((), ())),
                               preferred_element_type=jnp.float32)    # (N, N), symmetric
    a_st = adj_ref[0] * gram                        # [source, target] weights, self-loops removed

    # graphconvblock1 ChebConv(K=2): z1 = h @ W0 + T1 @ W1 + b  (BatchNorm finalized next stage)
    t1 = _cheb_t1(a_st, h)
    z1_ref[0] = (jnp.dot(h, gcn1_w_ref[0], preferred_element_type=jnp.float32)
                 + jnp.dot(t1, gcn1_w_ref[1], preferred_element_type=jnp.float32)
                 + vec[4:5])
    ast_ref[0] = a_st                               # reused (same edge weights) by stage 2


def stage2_kernel(z1_ref, ast_ref, gcn2_w_ref, vec_ref, z2_ref):
    """Per-sample: BatchNorm-1 (precomputed scale/shift) + LeakyReLU -> ChebConv-2 (pre-BN)."""
    vec = vec_ref[...]                              # row 0 bn1 scale, row 1 bn1 shift, row 2 gcn2 bias
    h = _lrelu(z1_ref[0] * vec[0:1] + vec[1:2])
    t1 = _cheb_t1(ast_ref[0], h)
    z2_ref[0] = (jnp.dot(h, gcn2_w_ref[0], preferred_element_type=jnp.float32)
                 + jnp.dot(t1, gcn2_w_ref[1], preferred_element_type=jnp.float32)
                 + vec[2:3])


def stage3_kernel(z2_ref, vec_ref, out_ref):
    """Per-sample: BatchNorm-2 (precomputed scale/shift) + LeakyReLU, lane-dense output."""
    vec = vec_ref[...]                              # row 0 bn2 scale, row 1 bn2 shift
    out_ref[0] = _lrelu(z2_ref[0] * vec[0:1] + vec[1:2])


@partial(jax.jit, static_argnames=("batch_size", "nroi", "input_size", "output_size"))
def decoder14_forward(x, style_vector, edge_index, edge_attr, params,
                      batch_size, nroi, input_size, output_size):
    """x: (B*nroi, input_size) node features (PyG layout), style_vector: (B, style_dim),
    edge_index: (2, E) over the batched/composite graph. edge_attr is accepted for signature
    parity with the reference forward but (like the reference) is never used.
    Returns (B, nroi, output_size)."""
    del edge_attr
    f32 = jnp.float32
    B, N = batch_size, nroi
    c_real = max(4 * input_size, 2 * input_size, input_size, output_size)
    C_PAD = ((c_real + 127) // 128) * 128           # lane-dense channel width (multiple of 128)

    def pad_cols(a):
        a = jnp.asarray(a, f32)
        return jnp.pad(a, ((0, 0), (0, C_PAD - a.shape[1])))

    def pad_mat(a):
        a = jnp.asarray(a, f32)
        return jnp.pad(a, ((0, C_PAD - a.shape[0]), (0, C_PAD - a.shape[1])))

    # node features -> (B, N, C_PAD)
    x_pad = pad_cols(jnp.asarray(x, f32)).reshape(B, N, C_PAD)

    # per-sample adjacency counts adj[b, source, target], built directly at (B, N, N) (no dense
    # (BN, BN) temp). Cross-sample edges would gather a zero from the block-diagonal composite
    # matrix in the reference, so they are dropped; ChebConv removes self-loops.
    src, dst = edge_index[0], edge_index[1]
    same = ((src // N) == (dst // N)).astype(f32)
    adj = jnp.zeros((B, N, N), f32).at[src // N, src % N, dst % N].add(same)
    adj = adj * (1.0 - jnp.eye(N, dtype=f32))[None]

    # style modulation gamma_i, beta_i = style @ Ws_i + bs_i : per sample, zero-padded channels,
    # packed as one (B, 8, C_PAD) slab (no repeat over nroi).
    gammas, betas = [], []
    for (W, b, Ws, bs) in params["mlp"]:
        cout = W.shape[1]
        gb = jnp.asarray(style_vector, f32) @ jnp.asarray(Ws, f32) + jnp.asarray(bs, f32)
        gammas.append(pad_cols(gb[:, :cout]))
        betas.append(pad_cols(gb[:, cout:]))
    mod = jnp.stack(gammas + betas, axis=1)                                     # (B, 8, C_PAD)

    # packed, zero-padded parameter slabs
    mlp_W = jnp.stack([pad_mat(W) for (W, b, Ws, bs) in params["mlp"]])         # (4, C, C)
    (W0a, W1a, b1, g1, be1) = params["gcn"][0]
    (W0b, W1b, b2, g2, be2) = params["gcn"][1]
    gcn1_W = jnp.stack([pad_mat(W0a), pad_mat(W1a)])                            # (2, C, C)
    gcn2_W = jnp.stack([pad_mat(W0b), pad_mat(W1b)])                            # (2, C, C)
    vec1 = jnp.zeros((8, C_PAD), f32)
    for i, (W, b, Ws, bs) in enumerate(params["mlp"]):
        vec1 = vec1.at[i].set(pad_cols(b)[0])
    vec1 = vec1.at[4].set(pad_cols(b1)[0])

    mosaic = pltpu.CompilerParams(dimension_semantics=("parallel",),
                                  vmem_limit_bytes=64 * 1024 * 1024)

    # ---- stage 1: MLP stack + gram edge weights + ChebConv-1 (pre-BatchNorm), per sample ----
    z1, a_st = pl.pallas_call(
        stage1_kernel,
        grid=(B,),
        in_specs=[
            pl.BlockSpec((1, N, C_PAD), lambda b: (b, 0, 0)),        # x
            pl.BlockSpec((1, N, N), lambda b: (b, 0, 0)),            # adjacency counts
            pl.BlockSpec((1, 8, C_PAD), lambda b: (b, 0, 0)),        # per-sample gamma/beta
            pl.BlockSpec((4, C_PAD, C_PAD), lambda b: (0, 0, 0)),    # fc weights
            pl.BlockSpec((2, C_PAD, C_PAD), lambda b: (0, 0, 0)),    # gcn1 W0/W1
            pl.BlockSpec((8, C_PAD), lambda b: (0, 0)),              # packed bias rows
        ],
        out_specs=(
            pl.BlockSpec((1, N, C_PAD), lambda b: (b, 0, 0)),
            pl.BlockSpec((1, N, N), lambda b: (b, 0, 0)),
        ),
        out_shape=(
            jax.ShapeDtypeStruct((B, N, C_PAD), f32),
            jax.ShapeDtypeStruct((B, N, N), f32),
        ),
        compiler_params=mosaic,
    )(x_pad, adj, mod, mlp_W, gcn1_W, vec1)

    # BatchNorm-1 statistics couple samples -> tiny cross-sample finalize between stages.
    # Padded channels have gamma = beta = 0, so scale/shift stay 0 there.
    mean1 = jnp.mean(z1, axis=(0, 1))
    var1 = jnp.mean(jnp.square(z1 - mean1), axis=(0, 1))
    scale1 = pad_cols(g1)[0] * jax.lax.rsqrt(var1 + EPS)
    shift1 = pad_cols(be1)[0] - mean1 * scale1
    vec2 = (jnp.zeros((8, C_PAD), f32)
            .at[0].set(scale1).at[1].set(shift1).at[2].set(pad_cols(b2)[0]))

    # ---- stage 2: BatchNorm-1 + LeakyReLU + ChebConv-2 (pre-BatchNorm), per sample ----
    z2 = pl.pallas_call(
        stage2_kernel,
        grid=(B,),
        in_specs=[
            pl.BlockSpec((1, N, C_PAD), lambda b: (b, 0, 0)),        # z1
            pl.BlockSpec((1, N, N), lambda b: (b, 0, 0)),            # a_st (edge weights)
            pl.BlockSpec((2, C_PAD, C_PAD), lambda b: (0, 0, 0)),    # gcn2 W0/W1
            pl.BlockSpec((8, C_PAD), lambda b: (0, 0)),              # bn1 scale/shift + gcn2 bias
        ],
        out_specs=pl.BlockSpec((1, N, C_PAD), lambda b: (b, 0, 0)),
        out_shape=jax.ShapeDtypeStruct((B, N, C_PAD), f32),
        compiler_params=mosaic,
    )(z1, a_st, gcn2_W, vec2)

    mean2 = jnp.mean(z2, axis=(0, 1))
    var2 = jnp.mean(jnp.square(z2 - mean2), axis=(0, 1))
    scale2 = pad_cols(g2)[0] * jax.lax.rsqrt(var2 + EPS)
    shift2 = pad_cols(be2)[0] - mean2 * scale2
    vec3 = jnp.zeros((8, C_PAD), f32).at[0].set(scale2).at[1].set(shift2)

    # ---- stage 3: BatchNorm-2 + LeakyReLU (lane-dense padded output) ----
    out_pad = pl.pallas_call(
        stage3_kernel,
        grid=(B,),
        in_specs=[
            pl.BlockSpec((1, N, C_PAD), lambda b: (b, 0, 0)),
            pl.BlockSpec((8, C_PAD), lambda b: (0, 0)),
        ],
        out_specs=pl.BlockSpec((1, N, C_PAD), lambda b: (b, 0, 0)),
        out_shape=jax.ShapeDtypeStruct((B, N, C_PAD), f32),
        compiler_params=mosaic,
    )(z2, vec3)

    # lane-padded slab -> (B, nroi, output_size), matching the reference's final reshape
    return out_pad[:, :, :output_size]


def init_params(key, input_size, output_size, style_dim):
    """Deterministic synthetic parameters mirroring the Decoder14 sub-modules."""

    def nxt():
        nonlocal key
        key, sub = jax.random.split(key)
        return sub

    def lin_w(cin, cout):
        return jax.random.normal(nxt(), (cin, cout), jnp.float32) / jnp.sqrt(float(cin))

    def lin_b(cout):
        return jax.random.normal(nxt(), (1, cout), jnp.float32) * 0.01

    def style_lin(cout):
        Ws = jax.random.normal(nxt(), (style_dim, 2 * cout), jnp.float32) / jnp.sqrt(float(style_dim))
        # bias so that style=0 gives gamma=1, beta=0
        bs = jnp.concatenate([jnp.ones((1, cout)), jnp.zeros((1, cout))], axis=1).astype(jnp.float32)
        return Ws, bs

    mlp = []
    for cin, cout in [(input_size, input_size), (input_size, input_size * 2),
                      (input_size * 2, input_size * 2), (input_size * 2, input_size * 4)]:
        Ws, bs = style_lin(cout)
        mlp.append((lin_w(cin, cout), lin_b(cout), Ws, bs))

    gcn = []
    for cin, cout in [(input_size * 4, input_size * 4), (input_size * 4, output_size)]:
        gcn.append((lin_w(cin, cout), lin_w(cin, cout), lin_b(cout),
                    jnp.ones((1, cout), jnp.float32),      # BatchNorm gamma
                    jnp.zeros((1, cout), jnp.float32)))    # BatchNorm beta

    return {"mlp": mlp, "gcn": gcn}


if __name__ == "__main__":
    input_size, output_size, style_dim = 8, 4, 16
    batch_size, nroi = 2, 16

    key = jax.random.PRNGKey(0)
    k_x, k_s, k_p = jax.random.split(key, 3)

    # PyG-style batched node features [B*nroi, C] and per-sample style vectors [B, style_dim]
    x = jax.random.normal(k_x, (batch_size * nroi, input_size), jnp.float32)
    style_vector = jax.random.normal(k_s, (batch_size, style_dim), jnp.float32)

    # batched undirected ring graph: edge_index over the composite graph (as a PyG Batch would give)
    i = jnp.arange(nroi)
    src1 = jnp.concatenate([i, (i + 1) % nroi])
    dst1 = jnp.concatenate([(i + 1) % nroi, i])
    src = jnp.concatenate([src1 + b * nroi for b in range(batch_size)])
    dst = jnp.concatenate([dst1 + b * nroi for b in range(batch_size)])
    edge_index = jnp.stack([src, dst])
    edge_attr = jnp.ones((edge_index.shape[1], 1), jnp.float32)  # unused by Decoder14.forward

    params = init_params(k_p, input_size, output_size, style_dim)

    out = decoder14_forward(x, style_vector, edge_index, edge_attr, params,
                            batch_size=batch_size, nroi=nroi,
                            input_size=input_size, output_size=output_size)
    out = jax.block_until_ready(out)
    assert out.shape == (batch_size, nroi, output_size)
    assert bool(jnp.all(jnp.isfinite(out)))
    print("KERNEL_OK")
</pallas_src>

<mosaic_0001>
module attributes {stable_mosaic.version = 11 : i64} {
  func.func @stage2_kernel(%arg0: i32, %arg1: memref<1x16x128xf32, #tpu.memory_space<vmem>>, %arg2: memref<1x16x16xf32, #tpu.memory_space<vmem>>, %arg3: memref<2x128x128xf32, #tpu.memory_space<vmem>>, %arg4: memref<8x128xf32, #tpu.memory_space<vmem>>, %arg5: memref<1x16x128xf32, #tpu.memory_space<vmem>>) attributes {dimension_semantics = [#tpu.dimension_semantics<parallel>], iteration_bounds = array<i64: 2>, scalar_prefetch = 0 : i64, scratch_operands = 0 : i64, tpu.core_type = #tpu.core_type<tc>, window_params = [{transform_indices = @transform_0, window_bounds = array<i64: 1, 16, 128>}, {transform_indices = @transform_1, window_bounds = array<i64: 1, 16, 16>}, {pipeline_mode = #tpu.pipeline_mode<synchronous>, transform_indices = @transform_2, window_bounds = array<i64: 2, 128, 128>}, {pipeline_mode = #tpu.pipeline_mode<synchronous>, transform_indices = @transform_3, window_bounds = array<i64: 8, 128>}, {transform_indices = @transform_4, window_bounds = array<i64: 1, 16, 128>}]} {
    %c0 = arith.constant 0 : index
    %c0_0 = arith.constant 0 : index
    %0 = vector.load %arg4[%c0, %c0_0] : memref<8x128xf32, #tpu.memory_space<vmem>>, vector<8x128xf32>
    %c0_1 = arith.constant 0 : index
    %c0_2 = arith.constant 0 : index
    %c0_3 = arith.constant 0 : index
    %1 = vector.load %arg1[%c0_1, %c0_2, %c0_3] : memref<1x16x128xf32, #tpu.memory_space<vmem>>, vector<1x16x128xf32>
    %2 = vector.shape_cast %1 : vector<1x16x128xf32> to vector<16x128xf32>
    %3 = vector.extract_strided_slice %0 {offsets = [0, 0], sizes = [1, 128], strides = [1, 1]} : vector<8x128xf32> to vector<1x128xf32>
    %4 = vector.broadcast %3 : vector<1x128xf32> to vector<16x128xf32>
    %5 = arith.mulf %2, %4 : vector<16x128xf32>
    %6 = vector.extract_strided_slice %0 {offsets = [1, 0], sizes = [1, 128], strides = [1, 1]} : vector<8x128xf32> to vector<1x128xf32>
    %7 = vector.broadcast %6 : vector<1x128xf32> to vector<16x128xf32>
    %8 = arith.addf %5, %7 : vector<16x128xf32>
    %cst = arith.constant 0.000000e+00 : f32
    %9 = vector.broadcast %cst : f32 to vector<16x128xf32>
    %10 = arith.cmpf oge, %8, %9 : vector<16x128xf32>
    %cst_4 = arith.constant 2.000000e-01 : f32
    %11 = vector.broadcast %cst_4 : f32 to vector<16x128xf32>
    %12 = arith.mulf %11, %8 : vector<16x128xf32>
    %13 = arith.select %10, %8, %12 : vector<16x128xi1>, vector<16x128xf32>
    %c0_5 = arith.constant 0 : index
    %c0_6 = arith.constant 0 : index
    %c0_7 = arith.constant 0 : index
    %14 = vector.load %arg2[%c0_5, %c0_6, %c0_7] : memref<1x16x16xf32, #tpu.memory_space<vmem>>, vector<1x16x16xf32>
    %15 = vector.shape_cast %14 : vector<1x16x16xf32> to vector<16x16xf32>
    %cst_8 = arith.constant dense<0.000000e+00> : vector<16xf32>
    %16 = vector.multi_reduction <add>, %15, %cst_8 [1] : vector<16x16xf32> to vector<16xf32>
    %17 = vector.shape_cast %16 : vector<16xf32> to vector<16x1xf32>
    %cst_9 = arith.constant 0.000000e+00 : f32
    %18 = vector.broadcast %cst_9 : f32 to vector<16x1xf32>
    %19 = arith.cmpf ogt, %17, %18 : vector<16x1xf32>
    %20 = math.rsqrt %17 : vector<16x1xf32>
    %cst_10 = arith.constant 0.000000e+00 : f32
    %21 = vector.broadcast %cst_10 : f32 to vector<16x1xf32>
    %22 = arith.select %19, %20, %21 : vector<16x1xi1>, vector<16x1xf32>
    %23 = vector.broadcast %22 : vector<16x1xf32> to vector<16x128xf32>
    %24 = arith.mulf %23, %13 : vector<16x128xf32>
    %25 = arith.truncf %24 : vector<16x128xf32> to vector<16x128xbf16>
    %26 = arith.truncf %15 : vector<16x16xf32> to vector<16x16xbf16>
    %cst_11 = arith.constant dense<0.000000e+00> : vector<16x128xf32>
    %27 = tpu.matmul %26, %25, %cst_11 {dimension_numbers = #tpu.dot_dimension_numbers<[0], [0], [1], [1], [0, 1, 1, 1], [], []>} : vector<16x16xbf16>, vector<16x128xbf16>, vector<16x128xf32> -> vector<16x128xf32>
    %28 = vector.broadcast %22 : vector<16x1xf32> to vector<16x128xf32>
    %29 = arith.mulf %28, %27 : vector<16x128xf32>
    %cst_12 = arith.constant 0.000000e+00 : f32
    %30 = vector.broadcast %cst_12 : f32 to vector<16x128xf32>
    %31 = arith.subf %30, %29 : vector<16x128xf32>
    %c0_13 = arith.constant 0 : index
    %c0_14 = arith.constant 0 : index
    %c0_15 = arith.constant 0 : index
    %32 = vector.load %arg3[%c0_13, %c0_14, %c0_15] : memref<2x128x128xf32, #tpu.memory_space<vmem>>, vector<1x128x128xf32>
    %33 = vector.shape_cast %32 : vector<1x128x128xf32> to vector<128x128xf32>
    %cst_16 = arith.constant dense<0.000000e+00> : vector<16x128xf32>
    %34 = tpu.matmul %13, %33, %cst_16 {dimension_numbers = #tpu.dot_dimension_numbers<[1], [0], [0], [1], [0, 0, 1, 1], [], []>} : vector<16x128xf32>, vector<128x128xf32>, vector<16x128xf32> -> vector<16x128xf32>
    %c1 = arith.constant 1 : index
    %c0_17 = arith.constant 0 : index
    %c0_18 = arith.constant 0 : index
    %35 = vector.load %arg3[%c1, %c0_17, %c0_18] : memref<2x128x128xf32, #tpu.memory_space<vmem>>, vector<1x128x128xf32>
    %36 = vector.shape_cast %35 : vector<1x128x128xf32> to vector<128x128xf32>
    %cst_19 = arith.constant dense<0.000000e+00> : vector<16x128xf32>
    %37 = tpu.matmul %31, %36, %cst_19 {dimension_numbers = #tpu.dot_dimension_numbers<[1], [0], [0], [1], [0, 0, 1, 1], [], []>} : vector<16x128xf32>, vector<128x128xf32>, vector<16x128xf32> -> vector<16x128xf32>
    %38 = arith.addf %34, %37 : vector<16x128xf32>
    %39 = vector.extract_strided_slice %0 {offsets = [2, 0], sizes = [1, 128], strides = [1, 1]} : vector<8x128xf32> to vector<1x128xf32>
    %40 = vector.broadcast %39 : vector<1x128xf32> to vector<16x128xf32>
    %41 = arith.addf %38, %40 : vector<16x128xf32>
    %c0_20 = arith.constant 0 : index
    %c0_21 = arith.constant 0 : index
    %c0_22 = arith.constant 0 : index
    %42 = vector.load %arg5[%c0_20, %c0_21, %c0_22] : memref<1x16x128xf32, #tpu.memory_space<vmem>>, vector<1x16x128xf32>
    %43 = vector.shape_cast %42 : vector<1x16x128xf32> to vector<16x128xf32>
    %44 = vector.shape_cast %41 : vector<16x128xf32> to vector<1x16x128xf32>
    tpu.vector_store %arg5[%c0_20, %c0_21, %c0_22], %44 {strides = array<i32>} : memref<1x16x128xf32, #tpu.memory_space<vmem>>, vector<1x16x128xf32>,
    return
  }
  func.func @transform_0(%arg0: i32) -> (i32, i32, i32) {
    %c0_i32 = arith.constant 0 : i32
    %c0_i32_0 = arith.constant 0 : i32
    %c0_i32_1 = arith.constant 0 : i32
    return %arg0, %c0_i32, %c0_i32_0 : i32, i32, i32
  }
  func.func @transform_1(%arg0: i32) -> (i32, i32, i32) {
    %c0_i32 = arith.constant 0 : i32
    %c0_i32_0 = arith.constant 0 : i32
    %c0_i32_1 = arith.constant 0 : i32
    return %arg0, %c0_i32, %c0_i32_0 : i32, i32, i32
  }
  func.func @transform_2(%arg0: i32) -> (i32, i32, i32) {
    %c0_i32 = arith.constant 0 : i32
    %c0_i32_0 = arith.constant 0 : i32
    %c0_i32_1 = arith.constant 0 : i32
    %c0_i32_2 = arith.constant 0 : i32
    return %c0_i32, %c0_i32_0, %c0_i32_1 : i32, i32, i32
  }
  func.func @transform_3(%arg0: i32) -> (i32, i32) {
    %c0_i32 = arith.constant 0 : i32
    %c0_i32_0 = arith.constant 0 : i32
    %c0_i32_1 = arith.constant 0 : i32
    return %c0_i32, %c0_i32_0 : i32, i32
  }
  func.func @transform_4(%arg0: i32) -> (i32, i32, i32) {
    %c0_i32 = arith.constant 0 : i32
    %c0_i32_0 = arith.constant 0 : i32
    %c0_i32_1 = arith.constant 0 : i32
    return %arg0, %c0_i32, %c0_i32_0 : i32, i32, i32
  }
}

module attributes {stable_mosaic.version = 11 : i64} {
  func.func @stage3_kernel(%arg0: i32, %arg1: memref<1x16x128xf32, #tpu.memory_space<vmem>>, %arg2: memref<8x128xf32, #tpu.memory_space<vmem>>, %arg3: memref<1x16x128xf32, #tpu.memory_space<vmem>>) attributes {dimension_semantics = [#tpu.dimension_semantics<parallel>], iteration_bounds = array<i64: 2>, scalar_prefetch = 0 : i64, scratch_operands = 0 : i64, tpu.core_type = #tpu.core_type<tc>, window_params = [{transform_indices = @transform_0, window_bounds = array<i64: 1, 16, 128>}, {pipeline_mode = #tpu.pipeline_mode<synchronous>, transform_indices = @transform_1, window_bounds = array<i64: 8, 128>}, {transform_indices = @transform_2, window_bounds = array<i64: 1, 16, 128>}]} {
    %c0 = arith.constant 0 : index
    %c0_0 = arith.constant 0 : index
    %0 = vector.load %arg2[%c0, %c0_0] : memref<8x128xf32, #tpu.memory_space<vmem>>, vector<8x128xf32>
    %c0_1 = arith.constant 0 : index
    %c0_2 = arith.constant 0 : index
    %c0_3 = arith.constant 0 : index
    %1 = vector.load %arg1[%c0_1, %c0_2, %c0_3] : memref<1x16x128xf32, #tpu.memory_space<vmem>>, vector<1x16x128xf32>
    %2 = vector.shape_cast %1 : vector<1x16x128xf32> to vector<16x128xf32>
    %3 = vector.extract_strided_slice %0 {offsets = [0, 0], sizes = [1, 128], strides = [1, 1]} : vector<8x128xf32> to vector<1x128xf32>
    %4 = vector.broadcast %3 : vector<1x128xf32> to vector<16x128xf32>
    %5 = arith.mulf %2, %4 : vector<16x128xf32>
    %6 = vector.extract_strided_slice %0 {offsets = [1, 0], sizes = [1, 128], strides = [1, 1]} : vector<8x128xf32> to vector<1x128xf32>
    %7 = vector.broadcast %6 : vector<1x128xf32> to vector<16x128xf32>
    %8 = arith.addf %5, %7 : vector<16x128xf32>
    %cst = arith.constant 0.000000e+00 : f32
    %9 = vector.broadcast %cst : f32 to vector<16x128xf32>
    %10 = arith.cmpf oge, %8, %9 : vector<16x128xf32>
    %cst_4 = arith.constant 2.000000e-01 : f32
    %11 = vector.broadcast %cst_4 : f32 to vector<16x128xf32>
    %12 = arith.mulf %11, %8 : vector<16x128xf32>
    %13 = arith.select %10, %8, %12 : vector<16x128xi1>, vector<16x128xf32>
    %c0_5 = arith.constant 0 : index
    %c0_6 = arith.constant 0 : index
    %c0_7 = arith.constant 0 : index
    %14 = vector.load %arg3[%c0_5, %c0_6, %c0_7] : memref<1x16x128xf32, #tpu.memory_space<vmem>>, vector<1x16x128xf32>
    %15 = vector.shape_cast %14 : vector<1x16x128xf32> to vector<16x128xf32>
    %16 = vector.shape_cast %13 : vector<16x128xf32> to vector<1x16x128xf32>
    tpu.vector_store %arg3[%c0_5, %c0_6, %c0_7], %16 {strides = array<i32>} : memref<1x16x128xf32, #tpu.memory_space<vmem>>, vector<1x16x128xf32>,
    return
  }
  func.func @transform_0(%arg0: i32) -> (i32, i32, i32) {
    %c0_i32 = arith.constant 0 : i32
    %c0_i32_0 = arith.constant 0 : i32
    %c0_i32_1 = arith.constant 0 : i32
    return %arg0, %c0_i32, %c0_i32_0 : i32, i32, i32
  }
  func.func @transform_1(%arg0: i32) -> (i32, i32) {
    %c0_i32 = arith.constant 0 : i32
    %c0_i32_0 = arith.constant 0 : i32
    %c0_i32_1 = arith.constant 0 : i32
    return %c0_i32, %c0_i32_0 : i32, i32
  }
  func.func @transform_2(%arg0: i32) -> (i32, i32, i32) {
    %c0_i32 = arith.constant 0 : i32
    %c0_i32_0 = arith.constant 0 : i32
    %c0_i32_1 = arith.constant 0 : i32
    return %arg0, %c0_i32, %c0_i32_0 : i32, i32, i32
  }
}

module attributes {stable_mosaic.version = 11 : i64} {
  func.func @stage1_kernel(%arg0: i32, %arg1: memref<1x16x128xf32, #tpu.memory_space<vmem>>, %arg2: memref<1x16x16xf32, #tpu.memory_space<vmem>>, %arg3: memref<1x8x128xf32, #tpu.memory_space<vmem>>, %arg4: memref<4x128x128xf32, #tpu.memory_space<vmem>>, %arg5: memref<2x128x128xf32, #tpu.memory_space<vmem>>, %arg6: memref<8x128xf32, #tpu.memory_space<vmem>>, %arg7: memref<1x16x128xf32, #tpu.memory_space<vmem>>, %arg8: memref<1x16x16xf32, #tpu.memory_space<vmem>>) attributes {dimension_semantics = [#tpu.dimension_semantics<parallel>], iteration_bounds = array<i64: 2>, scalar_prefetch = 0 : i64, scratch_operands = 0 : i64, tpu.core_type = #tpu.core_type<tc>, window_params = [{transform_indices = @transform_0, window_bounds = array<i64: 1, 16, 128>}, {transform_indices = @transform_1, window_bounds = array<i64: 1, 16, 16>}, {transform_indices = @transform_2, window_bounds = array<i64: 1, 8, 128>}, {pipeline_mode = #tpu.pipeline_mode<synchronous>, transform_indices = @transform_3, window_bounds = array<i64: 4, 128, 128>}, {pipeline_mode = #tpu.pipeline_mode<synchronous>, transform_indices = @transform_4, window_bounds = array<i64: 2, 128, 128>}, {pipeline_mode = #tpu.pipeline_mode<synchronous>, transform_indices = @transform_5, window_bounds = array<i64: 8, 128>}, {transform_indices = @transform_6, window_bounds = array<i64: 1, 16, 128>}, {transform_indices = @transform_7, window_bounds = array<i64: 1, 16, 16>}]} {
    %c0 = arith.constant 0 : index
    %c0_0 = arith.constant 0 : index
    %c0_1 = arith.constant 0 : index
    %0 = vector.load %arg1[%c0, %c0_0, %c0_1] : memref<1x16x128xf32, #tpu.memory_space<vmem>>, vector<1x16x128xf32>
    %1 = vector.shape_cast %0 : vector<1x16x128xf32> to vector<16x128xf32>
    %c0_2 = arith.constant 0 : index
    %c0_3 = arith.constant 0 : index
    %c0_4 = arith.constant 0 : index
    %2 = vector.load %arg3[%c0_2, %c0_3, %c0_4] : memref<1x8x128xf32, #tpu.memory_space<vmem>>, vector<1x8x128xf32>
    %3 = vector.shape_cast %2 : vector<1x8x128xf32> to vector<8x128xf32>
    %c0_5 = arith.constant 0 : index
    %c0_6 = arith.constant 0 : index
    %4 = vector.load %arg6[%c0_5, %c0_6] : memref<8x128xf32, #tpu.memory_space<vmem>>, vector<8x128xf32>
    %c0_7 = arith.constant 0 : index
    %c0_8 = arith.constant 0 : index
    %c0_9 = arith.constant 0 : index
    %5 = vector.load %arg4[%c0_7, %c0_8, %c0_9] : memref<4x128x128xf32, #tpu.memory_space<vmem>>, vector<1x128x128xf32>
    %6 = vector.shape_cast %5 : vector<1x128x128xf32> to vector<128x128xf32>
    %cst = arith.constant dense<0.000000e+00> : vector<16x128xf32>
    %7 = tpu.matmul %1, %6, %cst {dimension_numbers = #tpu.dot_dimension_numbers<[1], [0], [0], [1], [0, 0, 1, 1], [], []>} : vector<16x128xf32>, vector<128x128xf32>, vector<16x128xf32> -> vector<16x128xf32>
    %8 = vector.extract_strided_slice %4 {offsets = [0, 0], sizes = [1, 128], strides = [1, 1]} : vector<8x128xf32> to vector<1x128xf32>
    %9 = vector.broadcast %8 : vector<1x128xf32> to vector<16x128xf32>
    %10 = arith.addf %7, %9 : vector<16x128xf32>
    %cst_10 = arith.constant dense<0.000000e+00> : vector<128xf32>
    %11 = vector.multi_reduction <add>, %10, %cst_10 [0] : vector<16x128xf32> to vector<128xf32>
    %12 = vector.shape_cast %11 : vector<128xf32> to vector<1x128xf32>
    %cst_11 = arith.constant 1.600000e+01 : f32
    %13 = vector.broadcast %cst_11 : f32 to vector<1x128xf32>
    %14 = arith.divf %12, %13 : vector<1x128xf32>
    %15 = vector.broadcast %14 : vector<1x128xf32> to vector<16x128xf32>
    %16 = arith.subf %10, %15 : vector<16x128xf32>
    %17 = arith.mulf %16, %16 : vector<16x128xf32>
    %cst_12 = arith.constant dense<0.000000e+00> : vector<128xf32>
    %18 = vector.multi_reduction <add>, %17, %cst_12 [0] : vector<16x128xf32> to vector<128xf32>
    %19 = vector.shape_cast %18 : vector<128xf32> to vector<1x128xf32>
    %cst_13 = arith.constant 1.600000e+01 : f32
    %20 = vector.broadcast %cst_13 : f32 to vector<1x128xf32>
    %21 = arith.divf %19, %20 : vector<1x128xf32>
    %22 = vector.broadcast %14 : vector<1x128xf32> to vector<16x128xf32>
    %23 = arith.subf %10, %22 : vector<16x128xf32>
    %cst_14 = arith.constant 9.99999974E-6 : f32
    %24 = vector.broadcast %cst_14 : f32 to vector<1x128xf32>
    %25 = arith.addf %21, %24 : vector<1x128xf32>
    %26 = math.rsqrt %25 : vector<1x128xf32>
    %27 = vector.broadcast %26 : vector<1x128xf32> to vector<16x128xf32>
    %28 = arith.mulf %23, %27 : vector<16x128xf32>
    %29 = vector.extract_strided_slice %3 {offsets = [0, 0], sizes = [1, 128], strides = [1, 1]} : vector<8x128xf32> to vector<1x128xf32>
    %30 = vector.broadcast %29 : vector<1x128xf32> to vector<16x128xf32>
    %31 = arith.mulf %30, %28 : vector<16x128xf32>
    %32 = vector.extract_strided_slice %3 {offsets = [4, 0], sizes = [1, 128], strides = [1, 1]} : vector<8x128xf32> to vector<1x128xf32>
    %33 = vector.broadcast %32 : vector<1x128xf32> to vector<16x128xf32>
    %34 = arith.addf %31, %33 : vector<16x128xf32>
    %cst_15 = arith.constant 0.000000e+00 : f32
    %35 = vector.broadcast %cst_15 : f32 to vector<16x128xf32>
    %36 = arith.cmpf oge, %34, %35 : vector<16x128xf32>
    %cst_16 = arith.constant 2.000000e-01 : f32
    %37 = vector.broadcast %cst_16 : f32 to vector<16x128xf32>
    %38 = arith.mulf %37, %34 : vector<16x128xf32>
    %39 = arith.select %36, %34, %38 : vector<16x128xi1>, vector<16x128xf32>
    %c1 = arith.constant 1 : index
    %c0_17 = arith.constant 0 : index
    %c0_18 = arith.constant 0 : index
    %40 = vector.load %arg4[%c1, %c0_17, %c0_18] : memref<4x128x128xf32, #tpu.memory_space<vmem>>, vector<1x128x128xf32>
    %41 = vector.shape_cast %40 : vector<1x128x128xf32> to vector<128x128xf32>
    %cst_19 = arith.constant dense<0.000000e+00> : vector<16x128xf32>
    %42 = tpu.matmul %39, %41, %cst_19 {dimension_numbers = #tpu.dot_dimension_numbers<[1], [0], [0], [1], [0, 0, 1, 1], [], []>} : vector<16x128xf32>, vector<128x128xf32>, vector<16x128xf32> -> vector<16x128xf32>
    %43 = vector.extract_strided_slice %4 {offsets = [1, 0], sizes = [1, 128], strides = [1, 1]} : vector<8x128xf32> to vector<1x128xf32>
    %44 = vector.broadcast %43 : vector<1x128xf32> to vector<16x128xf32>
    %45 = arith.addf %42, %44 : vector<16x128xf32>
    %cst_20 = arith.constant dense<0.000000e+00> : vector<128xf32>
    %46 = vector.multi_reduction <add>, %45, %cst_20 [0] : vector<16x128xf32> to vector<128xf32>
    %47 = vector.shape_cast %46 : vector<128xf32> to vector<1x128xf32>
    %cst_21 = arith.constant 1.600000e+01 : f32
    %48 = vector.broadcast %cst_21 : f32 to vector<1x128xf32>
    %49 = arith.divf %47, %48 : vector<1x128xf32>
    %50 = vector.broadcast %49 : vector<1x128xf32> to vector<16x128xf32>
    %51 = arith.subf %45, %50 : vector<16x128xf32>
    %52 = arith.mulf %51, %51 : vector<16x128xf32>
    %cst_22 = arith.constant dense<0.000000e+00> : vector<128xf32>
    %53 = vector.multi_reduction <add>, %52, %cst_22 [0] : vector<16x128xf32> to vector<128xf32>
    %54 = vector.shape_cast %53 : vector<128xf32> to vector<1x128xf32>
    %cst_23 = arith.constant 1.600000e+01 : f32
    %55 = vector.broadcast %cst_23 : f32 to vector<1x128xf32>
    %56 = arith.divf %54, %55 : vector<1x128xf32>
    %57 = vector.broadcast %49 : vector<1x128xf32> to vector<16x128xf32>
    %58 = arith.subf %45, %57 : vector<16x128xf32>
    %cst_24 = arith.constant 9.99999974E-6 : f32
    %59 = vector.broadcast %cst_24 : f32 to vector<1x128xf32>
    %60 = arith.addf %56, %59 : vector<1x128xf32>
    %61 = math.rsqrt %60 : vector<1x128xf32>
    %62 = vector.broadcast %61 : vector<1x128xf32> to vector<16x128xf32>
    %63 = arith.mulf %58, %62 : vector<16x128xf32>
    %64 = vector.extract_strided_slice %3 {offsets = [1, 0], sizes = [1, 128], strides = [1, 1]} : vector<8x128xf32> to vector<1x128xf32>
    %65 = vector.broadcast %64 : vector<1x128xf32> to vector<16x128xf32>
    %66 = arith.mulf %65, %63 : vector<16x128xf32>
    %67 = vector.extract_strided_slice %3 {offsets = [5, 0], sizes = [1, 128], strides = [1, 1]} : vector<8x128xf32> to vector<1x128xf32>
    %68 = vector.broadcast %67 : vector<1x128xf32> to vector<16x128xf32>
    %69 = arith.addf %66, %68 : vector<16x128xf32>
    %cst_25 = arith.constant 0.000000e+00 : f32
    %70 = vector.broadcast %cst_25 : f32 to vector<16x128xf32>
    %71 = arith.cmpf oge, %69, %70 : vector<16x128xf32>
    %cst_26 = arith.constant 2.000000e-01 : f32
    %72 = vector.broadcast %cst_26 : f32 to vector<16x128xf32>
    %73 = arith.mulf %72, %69 : vector<16x128xf32>
    %74 = arith.select %71, %69, %73 : vector<16x128xi1>, vector<16x128xf32>
    %c2 = arith.constant 2 : index
    %c0_27 = arith.constant 0 : index
    %c0_28 = arith.constant 0 : index
    %75 = vector.load %arg4[%c2, %c0_27, %c0_28] : memref<4x128x128xf32, #tpu.memory_space<vmem>>, vector<1x128x128xf32>
    %76 = vector.shape_cast %75 : vector<1x128x128xf32> to vector<128x128xf32>
    %cst_29 = arith.constant dense<0.000000e+00> : vector<16x128xf32>
    %77 = tpu.matmul %74, %76, %cst_29 {dimension_numbers = #tpu.dot_dimension_numbers<[1], [0], [0], [1], [0, 0, 1, 1], [], []>} : vector<16x128xf32>, vector<128x128xf32>, vector<16x128xf32> -> vector<16x128xf32>
    %78 = vector.extract_strided_slice %4 {offsets = [2, 0], sizes = [1, 128], strides = [1, 1]} : vector<8x128xf32> to vector<1x128xf32>
    %79 = vector.broadcast %78 : vector<1x128xf32> to vector<16x128xf32>
    %80 = arith.addf %77, %79 : vector<16x128xf32>
    %cst_30 = arith.constant dense<0.000000e+00> : vector<128xf32>
    %81 = vector.multi_reduction <add>, %80, %cst_30 [0] : vector<16x128xf32> to vector<128xf32>
    %82 = vector.shape_cast %81 : vector<128xf32> to vector<1x128xf32>
    %cst_31 = arith.constant 1.600000e+01 : f32
    %83 = vector.broadcast %cst_31 : f32 to vector<1x128xf32>
    %84 = arith.divf %82, %83 : vector<1x128xf32>
    %85 = vector.broadcast %84 : vector<1x128xf32> to vector<16x128xf32>
    %86 = arith.subf %80, %85 : vector<16x128xf32>
    %87 = arith.mulf %86, %86 : vector<16x128xf32>
    %cst_32 = arith.constant dense<0.000000e+00> : vector<128xf32>
    %88 = vector.multi_reduction <add>, %87, %cst_32 [0] : vector<16x128xf32> to vector<128xf32>
    %89 = vector.shape_cast %88 : vector<128xf32> to vector<1x128xf32>
    %cst_33 = arith.constant 1.600000e+01 : f32
    %90 = vector.broadcast %cst_33 : f32 to vector<1x128xf32>
    %91 = arith.divf %89, %90 : vector<1x128xf32>
    %92 = vector.broadcast %84 : vector<1x128xf32> to vector<16x128xf32>
    %93 = arith.subf %80, %92 : vector<16x128xf32>
    %cst_34 = arith.constant 9.99999974E-6 : f32
    %94 = vector.broadcast %cst_34 : f32 to vector<1x128xf32>
    %95 = arith.addf %91, %94 : vector<1x128xf32>
    %96 = math.rsqrt %95 : vector<1x128xf32>
    %97 = vector.broadcast %96 : vector<1x128xf32> to vector<16x128xf32>
    %98 = arith.mulf %93, %97 : vector<16x128xf32>
    %99 = vector.extract_strided_slice %3 {offsets = [2, 0], sizes = [1, 128], strides = [1, 1]} : vector<8x128xf32> to vector<1x128xf32>
    %100 = vector.broadcast %99 : vector<1x128xf32> to vector<16x128xf32>
    %101 = arith.mulf %100, %98 : vector<16x128xf32>
    %102 = vector.extract_strided_slice %3 {offsets = [6, 0], sizes = [1, 128], strides = [1, 1]} : vector<8x128xf32> to vector<1x128xf32>
    %103 = vector.broadcast %102 : vector<1x128xf32> to vector<16x128xf32>
    %104 = arith.addf %101, %103 : vector<16x128xf32>
    %cst_35 = arith.constant 0.000000e+00 : f32
    %105 = vector.broadcast %cst_35 : f32 to vector<16x128xf32>
    %106 = arith.cmpf oge, %104, %105 : vector<16x128xf32>
    %cst_36 = arith.constant 2.000000e-01 : f32
    %107 = vector.broadcast %cst_36 : f32 to vector<16x128xf32>
    %108 = arith.mulf %107, %104 : vector<16x128xf32>
    %109 = arith.select %106, %104, %108 : vector<16x128xi1>, vector<16x128xf32>
    %c3 = arith.constant 3 : index
    %c0_37 = arith.constant 0 : index
    %c0_38 = arith.constant 0 : index
    %110 = vector.load %arg4[%c3, %c0_37, %c0_38] : memref<4x128x128xf32, #tpu.memory_space<vmem>>, vector<1x128x128xf32>
    %111 = vector.shape_cast %110 : vector<1x128x128xf32> to vector<128x128xf32>
    %cst_39 = arith.constant dense<0.000000e+00> : vector<16x128xf32>
    %112 = tpu.matmul %109, %111, %cst_39 {dimension_numbers = #tpu.dot_dimension_numbers<[1], [0], [0], [1], [0, 0, 1, 1], [], []>} : vector<16x128xf32>, vector<128x128xf32>, vector<16x128xf32> -> vector<16x128xf32>
    %113 = vector.extract_strided_slice %4 {offsets = [3, 0], sizes = [1, 128], strides = [1, 1]} : vector<8x128xf32> to vector<1x128xf32>
    %114 = vector.broadcast %113 : vector<1x128xf32> to vector<16x128xf32>
    %115 = arith.addf %112, %114 : vector<16x128xf32>
    %cst_40 = arith.constant dense<0.000000e+00> : vector<128xf32>
    %116 = vector.multi_reduction <add>, %115, %cst_40 [0] : vector<16x128xf32> to vector<128xf32>
    %117 = vector.shape_cast %116 : vector<128xf32> to vector<1x128xf32>
    %cst_41 = arith.constant 1.600000e+01 : f32
    %118 = vector.broadcast %cst_41 : f32 to vector<1x128xf32>
    %119 = arith.divf %117, %118 : vector<1x128xf32>
    %120 = vector.broadcast %119 : vector<1x128xf32> to vector<16x128xf32>
    %121 = arith.subf %115, %120 : vector<16x128xf32>
    %122 = arith.mulf %121, %121 : vector<16x128xf32>
    %cst_42 = arith.constant dense<0.000000e+00> : vector<128xf32>
    %123 = vector.multi_reduction <add>, %122, %cst_42 [0] : vector<16x128xf32> to vector<128xf32>
    %124 = vector.shape_cast %123 : vector<128xf32> to vector<1x128xf32>
    %cst_43 = arith.constant 1.600000e+01 : f32
    %125 = vector.broadcast %cst_43 : f32 to vector<1x128xf32>
    %126 = arith.divf %124, %125 : vector<1x128xf32>
    %127 = vector.broadcast %119 : vector<1x128xf32> to vector<16x128xf32>
    %128 = arith.subf %115, %127 : vector<16x128xf32>
    %cst_44 = arith.constant 9.99999974E-6 : f32
    %129 = vector.broadcast %cst_44 : f32 to vector<1x128xf32>
    %130 = arith.addf %126, %129 : vector<1x128xf32>
    %131 = math.rsqrt %130 : vector<1x128xf32>
    %132 = vector.broadcast %131 : vector<1x128xf32> to vector<16x128xf32>
    %133 = arith.mulf %128, %132 : vector<16x128xf32>
    %134 = vector.extract_strided_slice %3 {offsets = [3, 0], sizes = [1, 128], strides = [1, 1]} : vector<8x128xf32> to vector<1x128xf32>
    %135 = vector.broadcast %134 : vector<1x128xf32> to vector<16x128xf32>
    %136 = arith.mulf %135, %133 : vector<16x128xf32>
    %137 = vector.extract_strided_slice %3 {offsets = [7, 0], sizes = [1, 128], strides = [1, 1]} : vector<8x128xf32> to vector<1x128xf32>
    %138 = vector.broadcast %137 : vector<1x128xf32> to vector<16x128xf32>
    %139 = arith.addf %136, %138 : vector<16x128xf32>
    %cst_45 = arith.constant 0.000000e+00 : f32
    %140 = vector.broadcast %cst_45 : f32 to vector<16x128xf32>
    %141 = arith.cmpf oge, %139, %140 : vector<16x128xf32>
    %cst_46 = arith.constant 2.000000e-01 : f32
    %142 = vector.broadcast %cst_46 : f32 to vector<16x128xf32>
    %143 = arith.mulf %142, %139 : vector<16x128xf32>
    %144 = arith.select %141, %139, %143 : vector<16x128xi1>, vector<16x128xf32>
    %145 = arith.truncf %144 : vector<16x128xf32> to vector<16x128xbf16>
    %cst_47 = arith.constant dense<0.000000e+00> : vector<16x16xf32>
    %146 = tpu.matmul %145, %145, %cst_47 {dimension_numbers = #tpu.dot_dimension_numbers<[1], [1], [0], [0], [0, 0, 1, 0], [], []>} : vector<16x128xbf16>, vector<16x128xbf16>, vector<16x16xf32> -> vector<16x16xf32>
    %c0_48 = arith.constant 0 : index
    %c0_49 = arith.constant 0 : index
    %c0_50 = arith.constant 0 : index
    %147 = vector.load %arg2[%c0_48, %c0_49, %c0_50] : memref<1x16x16xf32, #tpu.memory_space<vmem>>, vector<1x16x16xf32>
    %148 = vector.shape_cast %147 : vector<1x16x16xf32> to vector<16x16xf32>
    %149 = arith.mulf %148, %146 : vector<16x16xf32>
    %cst_51 = arith.constant dense<0.000000e+00> : vector<16xf32>
    %150 = vector.multi_reduction <add>, %149, %cst_51 [1] : vector<16x16xf32> to vector<16xf32>
    %151 = vector.shape_cast %150 : vector<16xf32> to vector<16x1xf32>
    %cst_52 = arith.constant 0.000000e+00 : f32
    %152 = vector.broadcast %cst_52 : f32 to vector<16x1xf32>
    %153 = arith.cmpf ogt, %151, %152 : vector<16x1xf32>
    %154 = math.rsqrt %151 : vector<16x1xf32>
    %cst_53 = arith.constant 0.000000e+00 : f32
    %155 = vector.broadcast %cst_53 : f32 to vector<16x1xf32>
    %156 = arith.select %153, %154, %155 : vector<16x1xi1>, vector<16x1xf32>
    %157 = vector.broadcast %156 : vector<16x1xf32> to vector<16x128xf32>
    %158 = arith.mulf %157, %144 : vector<16x128xf32>
    %159 = arith.truncf %158 : vector<16x128xf32> to vector<16x128xbf16>
    %160 = arith.truncf %149 : vector<16x16xf32> to vector<16x16xbf16>
    %cst_54 = arith.constant dense<0.000000e+00> : vector<16x128xf32>
    %161 = tpu.matmul %160, %159, %cst_54 {dimension_numbers = #tpu.dot_dimension_numbers<[0], [0], [1], [1], [0, 1, 1, 1], [], []>} : vector<16x16xbf16>, vector<16x128xbf16>, vector<16x128xf32> -> vector<16x128xf32>
    %162 = vector.broadcast %156 : vector<16x1xf32> to vector<16x128xf32>
    %163 = arith.mulf %162, %161 : vector<16x128xf32>
    %cst_55 = arith.constant 0.000000e+00 : f32
    %164 = vector.broadcast %cst_55 : f32 to vector<16x128xf32>
    %165 = arith.subf %164, %163 : vector<16x128xf32>
    %c0_56 = arith.constant 0 : index
    %c0_57 = arith.constant 0 : index
    %c0_58 = arith.constant 0 : index
    %166 = vector.load %arg5[%c0_56, %c0_57, %c0_58] : memref<2x128x128xf32, #tpu.memory_space<vmem>>, vector<1x128x128xf32>
    %167 = vector.shape_cast %166 : vector<1x128x128xf32> to vector<128x128xf32>
    %cst_59 = arith.constant dense<0.000000e+00> : vector<16x128xf32>
    %168 = tpu.matmul %144, %167, %cst_59 {dimension_numbers = #tpu.dot_dimension_numbers<[1], [0], [0], [1], [0, 0, 1, 1], [], []>} : vector<16x128xf32>, vector<128x128xf32>, vector<16x128xf32> -> vector<16x128xf32>
    %c1_60 = arith.constant 1 : index
    %c0_61 = arith.constant 0 : index
    %c0_62 = arith.constant 0 : index
    %169 = vector.load %arg5[%c1_60, %c0_61, %c0_62] : memref<2x128x128xf32, #tpu.memory_space<vmem>>, vector<1x128x128xf32>
    %170 = vector.shape_cast %169 : vector<1x128x128xf32> to vector<128x128xf32>
    %cst_63 = arith.constant dense<0.000000e+00> : vector<16x128xf32>
    %171 = tpu.matmul %165, %170, %cst_63 {dimension_numbers = #tpu.dot_dimension_numbers<[1], [0], [0], [1], [0, 0, 1, 1], [], []>} : vector<16x128xf32>, vector<128x128xf32>, vector<16x128xf32> -> vector<16x128xf32>
    %172 = arith.addf %168, %171 : vector<16x128xf32>
    %173 = vector.extract_strided_slice %4 {offsets = [4, 0], sizes = [1, 128], strides = [1, 1]} : vector<8x128xf32> to vector<1x128xf32>
    %174 = vector.broadcast %173 : vector<1x128xf32> to vector<16x128xf32>
    %175 = arith.addf %172, %174 : vector<16x128xf32>
    %c0_64 = arith.constant 0 : index
    %c0_65 = arith.constant 0 : index
    %c0_66 = arith.constant 0 : index
    %176 = vector.load %arg7[%c0_64, %c0_65, %c0_66] : memref<1x16x128xf32, #tpu.memory_space<vmem>>, vector<1x16x128xf32>
    %177 = vector.shape_cast %176 : vector<1x16x128xf32> to vector<16x128xf32>
    %178 = vector.shape_cast %175 : vector<16x128xf32> to vector<1x16x128xf32>
    tpu.vector_store %arg7[%c0_64, %c0_65, %c0_66], %178 {strides = array<i32>} : memref<1x16x128xf32, #tpu.memory_space<vmem>>, vector<1x16x128xf32>,
    %c0_67 = arith.constant 0 : index
    %c0_68 = arith.constant 0 : index
    %c0_69 = arith.constant 0 : index
    %179 = vector.load %arg8[%c0_67, %c0_68, %c0_69] : memref<1x16x16xf32, #tpu.memory_space<vmem>>, vector<1x16x16xf32>
    %180 = vector.shape_cast %179 : vector<1x16x16xf32> to vector<16x16xf32>
    %181 = vector.shape_cast %149 : vector<16x16xf32> to vector<1x16x16xf32>
    tpu.vector_store %arg8[%c0_67, %c0_68, %c0_69], %181 {strides = array<i32>} : memref<1x16x16xf32, #tpu.memory_space<vmem>>, vector<1x16x16xf32>,
    return
  }
  func.func @transform_0(%arg0: i32) -> (i32, i32, i32) {
    %c0_i32 = arith.constant 0 : i32
    %c0_i32_0 = arith.constant 0 : i32
    %c0_i32_1 = arith.constant 0 : i32
    return %arg0, %c0_i32, %c0_i32_0 : i32, i32, i32
  }
  func.func @transform_1(%arg0: i32) -> (i32, i32, i32) {
    %c0_i32 = arith.constant 0 : i32
    %c0_i32_0 = arith.constant 0 : i32
    %c0_i32_1 = arith.constant 0 : i32
    return %arg0, %c0_i32, %c0_i32_0 : i32, i32, i32
  }
  func.func @transform_2(%arg0: i32) -> (i32, i32, i32) {
    %c0_i32 = arith.constant 0 : i32
    %c0_i32_0 = arith.constant 0 : i32
    %c0_i32_1 = arith.constant 0 : i32
    return %arg0, %c0_i32, %c0_i32_0 : i32, i32, i32
  }
  func.func @transform_3(%arg0: i32) -> (i32, i32, i32) {
    %c0_i32 = arith.constant 0 : i32
    %c0_i32_0 = arith.constant 0 : i32
    %c0_i32_1 = arith.constant 0 : i32
    %c0_i32_2 = arith.constant 0 : i32
    return %c0_i32, %c0_i32_0, %c0_i32_1 : i32, i32, i32
  }
  func.func @transform_4(%arg0: i32) -> (i32, i32, i32) {
    %c0_i32 = arith.constant 0 : i32
    %c0_i32_0 = arith.constant 0 : i32
    %c0_i32_1 = arith.constant 0 : i32
    %c0_i32_2 = arith.constant 0 : i32
    return %c0_i32, %c0_i32_0, %c0_i32_1 : i32, i32, i32
  }
  func.func @transform_5(%arg0: i32) -> (i32, i32) {
    %c0_i32 = arith.constant 0 : i32
    %c0_i32_0 = arith.constant 0 : i32
    %c0_i32_1 = arith.constant 0 : i32
    return %c0_i32, %c0_i32_0 : i32, i32
  }
  func.func @transform_6(%arg0: i32) -> (i32, i32, i32) {
    %c0_i32 = arith.constant 0 : i32
    %c0_i32_0 = arith.constant 0 : i32
    %c0_i32_1 = arith.constant 0 : i32
    return %arg0, %c0_i32, %c0_i32_0 : i32, i32, i32
  }
  func.func @transform_7(%arg0: i32) -> (i32, i32, i32) {
    %c0_i32 = arith.constant 0 : i32
    %c0_i32_0 = arith.constant 0 : i32
    %c0_i32_1 = arith.constant 0 : i32
    return %arg0, %c0_i32, %c0_i32_0 : i32, i32, i32
  }
}

</mosaic_0001>

<bundles_post_ra>
// kernel: decoder14_forward.5
= control target key start
LH: loop header
LB: loop body
LE: loop exit
PB: predicated region body
PF: predicated region fallthrough
CT: control target
= control target key end

     0   :  { %s260_s9 = smov 0   ;;  %s280_s0 = inlined_call_operand.vmem [shape: f32[2,16,128], index: 0, kind: input, shape index: {}]   ;;  %s281_s1 = inlined_call_operand.vmem [shape: f32[8,128], index: 1, kind: input, shape index: {}]   ;;  %s282_s2 = inlined_call_operand.vmem [shape: f32[2,16,128], index: 2, kind: output, shape index: {}]  }
   0x1 LB: > { %s216_s10 = sadd.s32 4294967295, %s243_s9   ;;  %p220_p0 = scmp.ge.s32.totalorder %s243_s9, 1  ;;  %s243_s9 = sphi %s260_s9, %s12_s9  }
   0x2   : > { %p112_p1 = scmp.lt.s32.totalorder %s243_s9, 3 }
   0x4   : > { %p113_p2 = pnand %p220_p0, %p112_p1 }
   0x5   : > { %p134_p3 = scmp.lt.s32.totalorder (!%p113_p2), %s216_s10, 1 }
   0x6   : > { %116 = sbr.rel (%p113_p2) target bundleno = 24 (0x18), region = 28 }
   0xb   : > { %v144_v0 = vld [vmem:[%s281_s1] sm:$0xff]  ;;  %s284_s10 = smov (!%p134_p3, %s216_s10), 1 }
   0xc   : > { %v147_v1 = vperm.slane %v144_v0, 0  ;;  %s227_s13 = sshll.u32 %s284_s10, 4  ;;  %v150_v2 = vperm.slane %v144_v0, 1 }
   0xd   : > { %s138_s16 = scalar_lea.vmem %s280_s0, %s227_s13  ;;  %s143_s19 = scalar_lea.vmem %s282_s2, %s227_s13 }
   0xe   : > { %v145_v3 = vld [vmem:[%s138_s16] sm:$0xff]  ;;  %v146_v4 = vld [vmem:[%s138_s16 + $0x8] sm:$0xff] }
   0xf   : > { %v148_v5 = vmul.f32 %v147_v1, %v145_v3  ;;  %v149_v6 = vmul.f32 %v147_v1, %v146_v4 }
  0x11   : > { %v151_v7 = vadd.f32 %v150_v2, %v148_v5  ;;  %v152_v8 = vadd.f32 %v150_v2, %v149_v6 }
  0x13   : > { %vm153_vm0 = vcmp.ge.f32.partialorder %v151_v7, 0.0  ;;  %v155_v9 = vmul.f32 0.2, %v151_v7  ;;  %vm154_vm1 = vcmp.ge.f32.partialorder %v152_v8, 0.0  ;;  %v156_v10 = vmul.f32 0.2, %v152_v8 }
  0x15   : > { %v157_v11 = vsel %vm153_vm0, %v151_v7, %v155_v9  ;;  %v158_v12 = vsel %vm154_vm1, %v152_v8, %v156_v10 }
  0x16   : > { %159 = vst [vmem:[%s143_s19] sm:$0xff] %v157_v11 }
  0x17   : > { %160 = vst [vmem:[%s143_s19 + $0x8] sm:$0xff] %v158_v12 }
  0x18 PF: > { %s12_s9 = sadd.s32 1, %s243_s9  }
  0x19   : > { %p9_p4 = scmp.ge.s32.totalorder %s12_s9, 4  }
  0x1b   :  { %11 = sbr.rel (!%p9_p4) target bundleno = 1 (0x1), region = 58 }

// kernel: decoder14_forward.4
= control target key start
LH: loop header
LB: loop body
LE: loop exit
PB: predicated region body
PF: predicated region fallthrough
CT: control target
= control target key end

     0   :  { %s570_s15 = smov 0   ;;  %s718_s0 = inlined_call_operand.vmem [shape: f32[2,16,128], index: 0, kind: input, shape index: {}]   ;;  %s719_s1 = inlined_call_operand.vmem [shape: f32[2,16,16], index: 1, kind: input, shape index: {}]   ;;  %s720_s2 = inlined_call_operand.vmem [shape: f32[2,128,128], index: 2, kind: input, shape index: {}]   ;;  %s721_s3 = inlined_call_operand.vmem [shape: f32[8,128], index: 3, kind: input, shape index: {}]   ;;  %s722_s4 = inlined_call_operand.vmem [shape: f32[2,16,128], index: 4, kind: output, shape index: {}]  }
   0x1 LB: > { %s459_s16 = sadd.s32 4294967295, %s543_s15   ;;  %p463_p0 = scmp.ge.s32.totalorder %s543_s15, 1  ;;  %s543_s15 = sphi %s570_s15, %s14_s15  }
   0x2   : > { %p172_p1 = scmp.lt.s32.totalorder %s543_s15, 3 }
   0x4   : > { %p173_p2 = pnand %p463_p0, %p172_p1 }
   0x5   : > { %p203_p3 = scmp.lt.s32.totalorder (!%p173_p2), %s459_s16, 1 }
   0x6   : > { %176 = sbr.rel (%p173_p2) target bundleno = 465 (0x1d1), region = 36 }
   0xb   : > { %s724_s16 = smov (!%p203_p3, %s459_s16), 1  ;;  %vm236_vm0 = vcmask 130048   ;;  %v589_v6 = vld [vmem:[%s721_s3] sm:$0xff]  ;;  %v486_v38 = vld [vmem:[%s720_s2 + $0xf8] sm:$0xff]  ;;  %v485_v39 = vld [vmem:[%s720_s2 + $0xf0] sm:$0xff] }
   0xc   : > { %s578_s17 = sshll.u32 %s724_s16, 4  ;;  %v222_v8 = vperm.slane %v589_v6, 0  ;;  %v225_v15 = vperm.slane %v589_v6, 1  ;;  %341 = vmatpush.msra.mxu1 %v486_v38  ;;  %v323_v40 = vld [vmem:[%s720_s2 + $0x78] sm:$0xff]  ;;  %492 = vmatpush.msra.mxu3 %v486_v38  ;;  %v484_v42 = vld [vmem:[%s720_s2 + $0xe8] sm:$0xff]  ;;  %v322_v43 = vld [vmem:[%s720_s2 + $0x70] sm:$0xff] }
   0xd   : > { %s212_s20 = scalar_lea.vmem %s719_s1, %s578_s17  ;;  %s207_s25 = scalar_lea.vmem %s718_s0, %s578_s17  ;;  %508 = vmatpush.msra.mxu2 %v323_v40  ;;  %v483_v44 = vld [vmem:[%s720_s2 + $0xe0] sm:$0xff]  ;;  %v321_v45 = vld [vmem:[%s720_s2 + $0x68] sm:$0xff]  ;;  %v482_v46 = vld [vmem:[%s720_s2 + $0xd8] sm:$0xff] }
   0xe   : > { %v234_v0 = vld [vmem:[%s212_s20] sm:$0xff]  ;;  %v235_v2 = vld [vmem:[%s212_s20 + $0x8] sm:$0xff]  ;;  %342 = vmatpush.msra.mxu1 %v485_v39  ;;  %493 = vmatpush.msra.mxu3 %v485_v39  ;;  %v481_v48 = vld [vmem:[%s720_s2 + $0xd0] sm:$0xff]  ;;  %s217_s20 = scalar_lea.vmem %s722_s4, %s578_s17 }
   0xf   : > { %v237_v1 = vsel %vm236_vm0, %v234_v0, 0.0  ;;  %v270_v3 = vpack.c.bf16 %v235_v2, %v234_v0  ;;  %v240_v4 = vsel %vm236_vm0, %v235_v2, 0.0  ;;  %v220_v9 = vld [vmem:[%s207_s25] sm:$0xff]  ;;  %v221_v12 = vld [vmem:[%s207_s25 + $0x8] sm:$0xff]  ;;  %509 = vmatpush.msra.mxu2 %v322_v43  ;;  %v319_v49 = vld [vmem:[%s720_s2 + $0x58] sm:$0xff] }
  0x10   : > { %238 = vadd.xlane.f32.xlu0 %v237_v1  ;;  %v223_v14 = vmul.f32 %v222_v8, %v220_v9  ;;  %v224_v17 = vmul.f32 %v222_v8, %v221_v12  ;;  %343 = vmatpush.msra.mxu1 %v484_v42  ;;  %v320_v47 = vld [vmem:[%s720_s2 + $0x60] sm:$0xff]  ;;  %v480_v50 = vld [vmem:[%s720_s2 + $0xc8] sm:$0xff]  ;;  %v318_v51 = vld [vmem:[%s720_s2 + $0x50] sm:$0xff] }
  0x11   : > { %271 = vxpose.xlu1.c.b16.start.end [1/1] (short) (narrow) %v270_v3, 16  ;;  %494 = vmatpush.msra.mxu3 %v484_v42  ;;  %v479_v52 = vld [vmem:[%s720_s2 + $0xc0] sm:$0xff]  ;;  %v317_v53 = vld [vmem:[%s720_s2 + $0x48] sm:$0xff]  ;;  %v478_v54 = vld [vmem:[%s720_s2 + $0xb8] sm:$0xff] }
  0x12   : > { %v226_v20 = vadd.f32 %v225_v15, %v223_v14  ;;  %v227_v23 = vadd.f32 %v225_v15, %v224_v17  ;;  %510 = vmatpush.msra.mxu2 %v321_v45  ;;  %344 = vmatpush.msra.mxu1 %v483_v44  ;;  %v316_v55 = vld [vmem:[%s720_s2 + $0x40] sm:$0xff]  ;;  %v477_v56 = vld [vmem:[%s720_s2 + $0xb0] sm:$0xff]  ;;  %v315_v57 = vld [vmem:[%s720_s2 + $0x38] sm:$0xff] }
  0x13   : > { %495 = vmatpush.msra.mxu3 %v483_v44  ;;  %v476_v58 = vld [vmem:[%s720_s2 + $0xa8] sm:$0xff]  ;;  %v314_v59 = vld [vmem:[%s720_s2 + $0x30] sm:$0xff]  ;;  %v475_v60 = vld [vmem:[%s720_s2 + $0xa0] sm:$0xff] }
  0x14   : > { %vm228_vm4 = vcmp.ge.f32.partialorder %v226_v20, 0.0  ;;  %v230_v25 = vmul.f32 0.2, %v226_v20  ;;  %v231_v28 = vmul.f32 0.2, %v227_v23  ;;  %vm229_vm8 = vcmp.ge.f32.partialorder %v227_v23, 0.0  ;;  %511 = vmatpush.msra.mxu2 %v320_v47  ;;  %345 = vmatpush.msra.mxu1 %v482_v46 }
  0x15   : > { %496 = vmatpush.msra.mxu3 %v482_v46  ;;  %v313_v61 = vld [vmem:[%s720_s2 + $0x28] sm:$0xff]  ;;  %v474_v62 = vld [vmem:[%s720_s2 + $0x98] sm:$0xff]  ;;  %v312_v63 = vld [vmem:[%s720_s2 + $0x20] sm:$0xff] }
  0x16   : > { %v597_v30 = vsel %vm228_vm4, %v226_v20, %v230_v25  ;;  %v601_v33 = vsel %vm229_vm8, %v227_v23, %v231_v28  ;;  %512 = vmatpush.msra.mxu2 %v319_v49  ;;  %346 = vmatpush.msra.mxu1 %v481_v48  ;;  %v311_v0 = vld [vmem:[%s720_s2 + $0x18] sm:$0xff]  ;;  %v473_v2 = vld [vmem:[%s720_s2 + $0x90] sm:$0xff]  ;;  %v308_v8 = vld [vmem:[%s720_s2] sm:$0xff] }
  0x17   : > { %497 = vmatpush.msra.mxu3 %v481_v48  ;;  %v310_v3 = vld [vmem:[%s720_s2 + $0x10] sm:$0xff] }
  0x18   : > { %241 = vadd.xlane.f32.xlu0 %v240_v4  ;;  %513 = vmatpush.msra.mxu2 %v318_v51  ;;  %v472_v4 = vld [vmem:[%s720_s2 + $0x88] sm:$0xff] }
  0x19   : > { %347 = vmatpush.msra.mxu1 %v480_v50  ;;  %498 = vmatpush.msra.mxu3 %v480_v50 }
  0x1a   : > { %514 = vmatpush.msra.mxu2 %v317_v53 }
  0x1b   : > { %348 = vmatpush.msra.mxu1 %v479_v52  ;;  %499 = vmatpush.msra.mxu3 %v479_v52 }
  0x1c   : > { %515 = vmatpush.msra.mxu2 %v316_v55 }
  0x1d   : > { %349 = vmatpush.msra.mxu1 %v478_v54  ;;  %500 = vmatpush.msra.mxu3 %v478_v54 }
  0x1e   : > { %516 = vmatpush.msra.mxu2 %v315_v57 }
  0x1f   : > { %350 = vmatpush.msra.mxu1 %v477_v56  ;;  %501 = vmatpush.msra.mxu3 %v477_v56 }
  0x20   : > { %517 = vmatpush.msra.mxu2 %v314_v59 }
  0x21   : > { %351 = vmatpush.msra.mxu1 %v476_v58  ;;  %502 = vmatpush.msra.mxu3 %v476_v58 }
  0x22   : > { %518 = vmatpush.msra.mxu2 %v313_v61 }
  0x23   : > { %352 = vmatpush.msra.mxu1 %v475_v60  ;;  %503 = vmatpush.msra.mxu3 %v475_v60 }
  0x24   : > { %519 = vmatpush.msra.mxu2 %v312_v63 }
  0x25   : > { %353 = vmatpush.msra.mxu1 %v474_v62  ;;  %504 = vmatpush.msra.mxu3 %v474_v62 }
  0x26   : > { %520 = vmatpush.msra.mxu2 %v311_v0 }
  0x27   : > { %354 = vmatpush.msra.mxu1 %v473_v2  ;;  %505 = vmatpush.msra.mxu3 %v473_v2 }
  0x28   : > { %521 = vmatpush.msra.mxu2 %v310_v3 }
  0x29   : > { %355 = vmatpush.msra.mxu1 %v472_v4  ;;  %506 = vmatpush.msra.mxu3 %v472_v4 }
  0x83   : > { %v239_v5 = vpop.xlane.xlu0 %238 }
  0x84   : > { %533 = vrsqrt.f32 %v239_v5  ;;  %vm251_vm1 = vweird.f32 %v239_v5  ;;  %vm243_vm5 = vcmp.gt.f32.partialorder %v239_v5, 0.0 }
  0x8a   : > { %v534_v7 = vpop.eup %533 }
  0x8b   : > { %v246_v10 = vmul.f32 %v534_v7, %v239_v5  ;;  %v242_v11 = vpop.xlane.xlu0 %241  ;;  %vm252_vm2 = vweird.f32 %v534_v7  ;;  %v309_v5 = vld [vmem:[%s720_s2 + $0x8] sm:$0xff] }
  0x8c   : > { %535 = vrsqrt.f32 %v242_v11  ;;  %vm253_vm3 = vmor %vm251_vm1, %vm252_vm2  ;;  %vm261_vm6 = vweird.f32 %v242_v11  ;;  %vm244_vm10 = vcmp.gt.f32.partialorder %v242_v11, 0.0  ;;  %522 = vmatpush.msra.mxu2 %v309_v5 }
  0x8d   : > { %v247_v13 = vmul.f32 %v534_v7, %v246_v10 }
  0x8e   : > { %523 = vmatpush.msra.mxu2 %v308_v8 }
  0x8f   : > { %v248_v16 = vmul.f32 0.5, %v247_v13  ;;  %383 = vmatmul.f32.vlgmr.msra.gmra.mxu2 %v601_v33 }
  0x91   : > { %v249_v18 = vsub.f32 1.5, %v248_v16  ;;  %v387_v16 = vperm.slane %v589_v6, 2 }
  0x92   : > { %v536_v19 = vpop.eup %535 }
  0x93   : > { %v256_v21 = vmul.f32 %v536_v19, %v242_v11  ;;  %v250_v22 = vmul.f32 %v534_v7, %v249_v18  ;;  %vm262_vm7 = vweird.f32 %v536_v19 }
  0x94   : > { %vm263_vm9 = vmor %vm261_vm6, %vm262_vm7 }
  0x95   : > { %v257_v24 = vmul.f32 %v536_v19, %v256_v21  ;;  %v254_v27 = vsel %vm253_vm3, %v534_v7, %v250_v22  ;;  %v471_v7 = vld [vmem:[%s720_s2 + $0x80] sm:$0xff] }
  0x96   : > { %v599_v31 = vsel %vm243_vm5, %v254_v27, 0.0  ;;  %356 = vmatpush.msra.mxu1 %v471_v7  ;;  %507 = vmatpush.msra.mxu3 %v471_v7 }
  0x97   : > { %v258_v26 = vmul.f32 0.5, %v257_v24  ;;  %v267_v35 = vmul.f32 %v599_v31, %v597_v30 }
  0x99   : > { %v259_v29 = vsub.f32 1.5, %v258_v26 }
  0x9b   : > { %v260_v32 = vmul.f32 %v536_v19, %v259_v29 }
  0x9d   : > { %v264_v34 = vsel %vm263_vm9, %v536_v19, %v260_v32 }
  0x9e   : > { %v605_v36 = vsel %vm244_vm10, %v264_v34, 0.0 }
  0x9f   : > { %v268_v37 = vmul.f32 %v605_v36, %v601_v33 }
  0xa1   : > { %v269_v41 = vpack.c.bf16 %v268_v37, %v267_v35 }
  0xa3   : > { %297 = vmatpush.bf16.msra.mxu0 %v269_v41 }
  0xa7   : > { %364 = vmatpush.msrb.mxu0 %v323_v40 }
  0xa9   : > { %365 = vmatpush.msrb.mxu0 %v322_v43 }
  0xab   : > { %366 = vmatpush.msrb.mxu0 %v321_v45 }
  0xad   : > { %367 = vmatpush.msrb.mxu0 %v320_v47 }
  0xaf   : > { %368 = vmatpush.msrb.mxu0 %v319_v49 }
  0xb1   : > { %369 = vmatpush.msrb.mxu0 %v318_v51 }
  0xb3   : > { %370 = vmatpush.msrb.mxu0 %v317_v53 }
  0xb5   : > { %371 = vmatpush.msrb.mxu0 %v316_v55 }
  0xb7   : > { %372 = vmatpush.msrb.mxu0 %v315_v57 }
  0xb9   : > { %373 = vmatpush.msrb.mxu0 %v314_v59 }
  0xbb   : > { %374 = vmatpush.msrb.mxu0 %v313_v61 }
  0xbd   : > { %375 = vmatpush.msrb.mxu0 %v312_v63  ;;  %v279_v1 = vpop.trf.xlu1 }
  0xbe   : > { %470 = vmatmul.msk.bf16.vlgmr.msra.gmra.mxu0 %vm236_vm0, %v279_v1 }
  0xbf   : > { %376 = vmatpush.msrb.mxu0 %v311_v0 }
  0xc1   : > { %377 = vmatpush.msrb.mxu0 %v310_v3 }
  0xc3   : > { %378 = vmatpush.msrb.mxu0 %v309_v5 }
  0xc5   : > { %379 = vmatpush.msrb.mxu0 %v308_v8 }
  0xce   : > { %380 = vmatmul.f32.vlgmr.msrb.gmra.mxu0 %v597_v30 }
 0x112   : > { %v384_v20 = vpop.f32.mrf.mxu2 }
 0x13b   : > { %v299_v9 = vpop.f32.mrf.mxu0 }
 0x13c   : > { %v304_v10 = vmul.f32 %v299_v9, %v599_v31 }
 0x13e   : > { %v306_v11 = vsub.f32 0.0, %v304_v10 }
 0x140   : > { %357 = vmatmul.f32.vlgmr.msra.gmra.mxu1 %v306_v11 }
 0x143   : > { %v301_v12 = vpop.f32.mrf.mxu0 }
 0x144   : > { %v305_v13 = vmul.f32 %v301_v12, %v605_v36 }
 0x146   : > { %v307_v14 = vsub.f32 0.0, %v305_v13 }
 0x148   : > { %360 = vmatmul.f32.vlgmr.msra.gmra.mxu3 %v307_v14 }
 0x14b   : > { %v381_v15 = vpop.f32.mrf.mxu0 }
 0x1bd   : > { %v358_v17 = vpop.f32.mrf.mxu1 }
 0x1be   : > { %v382_v18 = vadd.f32 %v381_v15, %v358_v17 }
 0x1c0   : > { %v388_v19 = vadd.f32 %v387_v16, %v382_v18 }
 0x1c2   : > { %390 = vst [vmem:[%s217_s20] sm:$0xff] %v388_v19 }
 0x1cb   : > { %v361_v21 = vpop.f32.mrf.mxu3 }
 0x1cc   : > { %v385_v22 = vadd.f32 %v384_v20, %v361_v21 }
 0x1ce   : > { %v389_v23 = vadd.f32 %v387_v16, %v385_v22 }
 0x1d0   : > { %391 = vst [vmem:[%s217_s20 + $0x8] sm:$0xff] %v389_v23 }
 0x1d1 PF: > { %s14_s15 = sadd.s32 1, %s543_s15  }
 0x1d2   : > { %p11_p4 = scmp.ge.s32.totalorder %s14_s15, 4  }
 0x1d4   :  { %13 = sbr.rel (!%p11_p4) target bundleno = 1 (0x1), region = 70 }

// kernel: decoder14_forward.3
= control target key start
LH: loop header
LB: loop body
LE: loop exit
PB: predicated region body
PF: predicated region fallthrough
CT: control target
= control target key end

     0   :  { %s1131_s24 = smov 0   ;;  %s1490_s0 = inlined_call_operand.vmem [shape: f32[2,16,128], index: 0, kind: input, shape index: {}]   ;;  %s1491_s1 = inlined_call_operand.vmem [shape: f32[2,16,16], index: 1, kind: input, shape index: {}]   ;;  %s1492_s2 = inlined_call_operand.vmem [shape: f32[2,8,128], index: 2, kind: input, shape index: {}]   ;;  %s1493_s3 = inlined_call_operand.vmem [shape: f32[4,128,128], index: 3, kind: input, shape index: {}]   ;;  %s1494_s4 = inlined_call_operand.vmem [shape: f32[2,128,128], index: 4, kind: input, shape index: {}]   ;;  %s1495_s5 = inlined_call_operand.vmem [shape: f32[8,128], index: 5, kind: input, shape index: {}]   ;;  %s1496_s6 = inlined_call_operand.vmem [shape: f32[2,16,128], index: 6, kind: output, shape index: {0}]   ;;  %s1497_s7 = inlined_call_operand.vmem [shape: f32[2,16,16], index: 7, kind: output, shape index: {1}]  }
   0x1 LB: > { %s973_s25 = sadd.s32 4294967295, %s1088_s24   ;;  %p977_p0 = scmp.ge.s32.totalorder %s1088_s24, 1  ;;  %s1088_s24 = sphi %s1131_s24, %s18_s24  }
   0x2   : > { %p259_p1 = scmp.lt.s32.totalorder %s1088_s24, 3 }
   0x4   : > { %p260_p2 = pnand %p977_p0, %p259_p1 }
   0x5   : > { %p305_p3 = scmp.lt.s32.totalorder (!%p260_p2), %s973_s25, 1 }
   0x6   : > { %263 = sbr.rel (%p260_p2) target bundleno = 1454 (0x5ae), region = 44 }
   0xb   : > { %v349_v0 = vld [vmem:[%s1493_s3 + $0x78] sm:$0xff]  ;;  %v348_v1 = vld [vmem:[%s1493_s3 + $0x70] sm:$0xff]  ;;  %v347_v2 = vld [vmem:[%s1493_s3 + $0x68] sm:$0xff]  ;;  %s1499_s25 = smov (!%p305_p3, %s973_s25), 1  ;;  %v1090_v18 = vmov 16.0  }
   0xc   : > { %351 = vmatpush.msra.mxu0 %v349_v0  ;;  %v346_v3 = vld [vmem:[%s1493_s3 + $0x60] sm:$0xff]  ;;  %v345_v4 = vld [vmem:[%s1493_s3 + $0x58] sm:$0xff]  ;;  %v344_v5 = vld [vmem:[%s1493_s3 + $0x50] sm:$0xff]  ;;  %s1181_s8 = sshll.u32 %s1499_s25, 4  ;;  %1068 = vrcp.f32 %v1090_v18  ;;  %s982_s12 = sshll.u32 %s1499_s25, 3 }
   0xd   : > { %v343_v6 = vld [vmem:[%s1493_s3 + $0x48] sm:$0xff]  ;;  %v342_v7 = vld [vmem:[%s1493_s3 + $0x40] sm:$0xff]  ;;  %v341_v8 = vld [vmem:[%s1493_s3 + $0x38] sm:$0xff]  ;;  %s309_s15 = scalar_lea.vmem %s1490_s0, %s1181_s8  ;;  %s314_s9 = scalar_lea.vmem %s1491_s1, %s1181_s8 }
   0xe   : > { %352 = vmatpush.msra.mxu0 %v348_v1  ;;  %v340_v9 = vld [vmem:[%s1493_s3 + $0x30] sm:$0xff]  ;;  %v339_v10 = vld [vmem:[%s1493_s3 + $0x28] sm:$0xff]  ;;  %v338_v11 = vld [vmem:[%s1493_s3 + $0x20] sm:$0xff]  ;;  %s323_s27 = scalar_lea.vmem %s1496_s6, %s1181_s8 }
   0xf   : > { %v337_v12 = vld [vmem:[%s1493_s3 + $0x18] sm:$0xff]  ;;  %v336_v13 = vld [vmem:[%s1493_s3 + $0x10] sm:$0xff]  ;;  %v335_v14 = vld [vmem:[%s1493_s3 + $0x8] sm:$0xff] }
  0x10   : > { %353 = vmatpush.msra.mxu0 %v347_v2  ;;  %v334_v15 = vld [vmem:[%s1493_s3] sm:$0xff]  ;;  %v331_v17 = vld [vmem:[%s309_s15 + $0x8] sm:$0xff]  ;;  %v1002_v29 = vld [vmem:[%s1493_s3 + $0xf8] sm:$0xff] }
  0x11   : > { %v330_v16 = vld [vmem:[%s309_s15] sm:$0xff]  ;;  %444 = vmatpush.msra.mxu1 %v1002_v29  ;;  %v1001_v32 = vld [vmem:[%s1493_s3 + $0xf0] sm:$0xff]  ;;  %v1000_v34 = vld [vmem:[%s1493_s3 + $0xe8] sm:$0xff]  ;;  %s318_s15 = scalar_lea.vmem %s1492_s2, %s982_s12  ;;  %s328_s12 = scalar_lea.vmem %s1497_s7, %s1181_s8 }
  0x12   : > { %354 = vmatpush.msra.mxu0 %v346_v3  ;;  %v1199_v20 = vld [vmem:[%s1495_s5] sm:$0xff]  ;;  %v1069_v21 = vpop.eup %1068  ;;  %v998_v39 = vld [vmem:[%s1493_s3 + $0xd8] sm:$0xff]  ;;  %v997_v42 = vld [vmem:[%s1493_s3 + $0xd0] sm:$0xff] }
  0x13   : > { %v350_v22 = vperm.slane %v1199_v20, 0  ;;  %v382_v23 = vmul.f32 16.0, %v1069_v21  ;;  %445 = vmatpush.msra.mxu1 %v1001_v32  ;;  %v999_v37 = vld [vmem:[%s1493_s3 + $0xe0] sm:$0xff]  ;;  %vm386_vm0 = vweird.f32 %v1069_v21  ;;  %v996_v44 = vld [vmem:[%s1493_s3 + $0xc8] sm:$0xff]  ;;  %v994_v49 = vld [vmem:[%s1493_s3 + $0xb8] sm:$0xff] }
  0x14   : > { %355 = vmatpush.msra.mxu0 %v345_v4  ;;  %v995_v46 = vld [vmem:[%s1493_s3 + $0xc0] sm:$0xff]  ;;  %v993_v52 = vld [vmem:[%s1493_s3 + $0xb0] sm:$0xff]  ;;  %v992_v54 = vld [vmem:[%s1493_s3 + $0xa8] sm:$0xff] }
  0x15   : > { %v383_v27 = vsub.f32 1.0, %v382_v23  ;;  %446 = vmatpush.msra.mxu1 %v1000_v34  ;;  %v991_v56 = vld [vmem:[%s1493_s3 + $0xa0] sm:$0xff]  ;;  %v990_v58 = vld [vmem:[%s1493_s3 + $0x98] sm:$0xff]  ;;  %v989_v60 = vld [vmem:[%s1493_s3 + $0x90] sm:$0xff] }
  0x16   : > { %356 = vmatpush.msra.mxu0 %v344_v5  ;;  %v988_v61 = vld [vmem:[%s1493_s3 + $0x88] sm:$0xff]  ;;  %v987_v63 = vld [vmem:[%s1493_s3 + $0x80] sm:$0xff] }
  0x17   : > { %v384_v31 = vmul.f32 %v1069_v21, %v383_v27  ;;  %447 = vmatpush.msra.mxu1 %v999_v37  ;;  %v1015_v37 = vld [vmem:[%s1493_s3 + $0x160] sm:$0xff] }
  0x18   : > { %357 = vmatpush.msra.mxu0 %v343_v6 }
  0x19   : > { %v385_v36 = vadd.f32 %v1069_v21, %v384_v31  ;;  %448 = vmatpush.msra.mxu1 %v998_v39  ;;  %v1018_v31 = vld [vmem:[%s1493_s3 + $0x178] sm:$0xff] }
  0x1a   : > { %358 = vmatpush.msra.mxu0 %v342_v7  ;;  %530 = vmatpush.msra.mxu2 %v1018_v31  ;;  %v1014_v39 = vld [vmem:[%s1493_s3 + $0x158] sm:$0xff] }
  0x1b   : > { %v1217_v41 = vsel %vm386_vm0, %v1069_v21, %v385_v36  ;;  %449 = vmatpush.msra.mxu1 %v997_v42  ;;  %v1013_v42 = vld [vmem:[%s1493_s3 + $0x150] sm:$0xff]  ;;  %v1034_v31 = vld [vmem:[%s1493_s3 + $0x1f8] sm:$0xff] }
  0x1c   : > { %359 = vmatpush.msra.mxu0 %v341_v8  ;;  %v1258_v8 = vld [vmem:[%s318_s15] sm:$0xff]  ;;  %616 = vmatpush.msra.mxu3 %v1034_v31  ;;  %v790_v31 = vld [vmem:[%s1494_s4 + $0x78] sm:$0xff] }
  0x1d   : > { %450 = vmatpush.msra.mxu1 %v996_v44  ;;  %v1012_v44 = vld [vmem:[%s1493_s3 + $0x148] sm:$0xff] }
  0x1e   : > { %360 = vmatpush.msra.mxu0 %v340_v9 }
  0x1f   : > { %451 = vmatpush.msra.mxu1 %v995_v46  ;;  %v1011_v46 = vld [vmem:[%s1493_s3 + $0x140] sm:$0xff] }
  0x20   : > { %361 = vmatpush.msra.mxu0 %v339_v10 }
  0x21   : > { %452 = vmatpush.msra.mxu1 %v994_v49  ;;  %v1010_v49 = vld [vmem:[%s1493_s3 + $0x138] sm:$0xff] }
  0x22   : > { %362 = vmatpush.msra.mxu0 %v338_v11  ;;  %v414_v11 = vperm.slane %v1258_v8, 0 }
  0x23   : > { %453 = vmatpush.msra.mxu1 %v993_v52  ;;  %v1009_v52 = vld [vmem:[%s1493_s3 + $0x130] sm:$0xff] }
  0x24   : > { %363 = vmatpush.msra.mxu0 %v337_v12 }
  0x25   : > { %454 = vmatpush.msra.mxu1 %v992_v54  ;;  %v1008_v54 = vld [vmem:[%s1493_s3 + $0x128] sm:$0xff] }
  0x26   : > { %364 = vmatpush.msra.mxu0 %v336_v13 }
  0x27   : > { %455 = vmatpush.msra.mxu1 %v991_v56  ;;  %v1007_v56 = vld [vmem:[%s1493_s3 + $0x120] sm:$0xff] }
  0x28   : > { %365 = vmatpush.msra.mxu0 %v335_v14 }
  0x29   : > { %456 = vmatpush.msra.mxu1 %v990_v58  ;;  %v1006_v58 = vld [vmem:[%s1493_s3 + $0x118] sm:$0xff] }
  0x2a   : > { %366 = vmatpush.msra.mxu0 %v334_v15  ;;  %v417_v15 = vperm.slane %v1258_v8, 4 }
  0x2b   : > { %367 = vmatmul.f32.vlgmr.msra.gmra.mxu0 %v330_v16  ;;  %457 = vmatpush.msra.mxu1 %v989_v60  ;;  %v1005_v60 = vld [vmem:[%s1493_s3 + $0x110] sm:$0xff] }
  0x2d   : > { %458 = vmatpush.msra.mxu1 %v988_v61  ;;  %v1004_v61 = vld [vmem:[%s1493_s3 + $0x108] sm:$0xff] }
  0x2f   : > { %459 = vmatpush.msra.mxu1 %v987_v63  ;;  %v1003_v63 = vld [vmem:[%s1493_s3 + $0x100] sm:$0xff] }
  0x33   : > { %370 = vmatmul.f32.gmra.mxu0 %v331_v17 }
  0xa8   : > { %v368_v19 = vpop.f32.mrf.mxu0 }
  0xa9   : > { %v369_v25 = vadd.f32 %v368_v19, %v350_v22 }
  0xb0   : > { %v371_v24 = vpop.f32.mrf.mxu0 }
  0xb1   : > { %v372_v26 = vadd.f32 %v371_v24, %v350_v22 }
  0xb3   : > { %v374_v28 = vadd.f32 %v372_v26, %v369_v25 }
  0xb5   : > { %v375_v30 = vrot.slane %v374_v28, 4 }
  0xb7   : > { %v376_v33 = vadd.f32 %v375_v30, %v374_v28 }
  0xb9   : > { %v377_v35 = vrot.slane %v376_v33, 2 }
  0xbb   : > { %v378_v38 = vadd.f32 %v377_v35, %v376_v33  ;;  %v1017_v33 = vld [vmem:[%s1493_s3 + $0x170] sm:$0xff]  ;;  %v1016_v35 = vld [vmem:[%s1493_s3 + $0x168] sm:$0xff] }
  0xbc   : > { %531 = vmatpush.msra.mxu2 %v1017_v33  ;;  %v1033_v33 = vld [vmem:[%s1493_s3 + $0x1f0] sm:$0xff] }
  0xbd   : > { %v379_v40 = vrot.slane %v378_v38, 1  ;;  %617 = vmatpush.msra.mxu3 %v1033_v33  ;;  %v789_v33 = vld [vmem:[%s1494_s4 + $0x70] sm:$0xff] }
  0xbe   : > { %532 = vmatpush.msra.mxu2 %v1016_v35  ;;  %v1032_v35 = vld [vmem:[%s1493_s3 + $0x1e8] sm:$0xff] }
  0xbf   : > { %v380_v43 = vadd.f32 %v379_v40, %v378_v38  ;;  %618 = vmatpush.msra.mxu3 %v1032_v35  ;;  %v788_v35 = vld [vmem:[%s1494_s4 + $0x68] sm:$0xff] }
  0xc0   : > { %533 = vmatpush.msra.mxu2 %v1015_v37  ;;  %v1031_v37 = vld [vmem:[%s1493_s3 + $0x1e0] sm:$0xff] }
  0xc1   : > { %v388_v45 = vmul.f32 %v1217_v41, %v380_v43  ;;  %619 = vmatpush.msra.mxu3 %v1031_v37  ;;  %v787_v37 = vld [vmem:[%s1494_s4 + $0x60] sm:$0xff] }
  0xc2   : > { %534 = vmatpush.msra.mxu2 %v1014_v39  ;;  %v1030_v39 = vld [vmem:[%s1493_s3 + $0x1d8] sm:$0xff] }
  0xc3   : > { %v389_v47 = vsub.f32 %v369_v25, %v388_v45  ;;  %v390_v48 = vsub.f32 %v372_v26, %v388_v45  ;;  %v443_v26 = vperm.slane %v1199_v20, 1  ;;  %620 = vmatpush.msra.mxu3 %v1030_v39  ;;  %v786_v39 = vld [vmem:[%s1494_s4 + $0x58] sm:$0xff] }
  0xc4   : > { %535 = vmatpush.msra.mxu2 %v1013_v42  ;;  %v1029_v42 = vld [vmem:[%s1493_s3 + $0x1d0] sm:$0xff] }
  0xc5   : > { %v391_v50 = vmul.f32 %v389_v47, %v389_v47  ;;  %v392_v51 = vmul.f32 %v390_v48, %v390_v48  ;;  %621 = vmatpush.msra.mxu3 %v1029_v42  ;;  %v785_v42 = vld [vmem:[%s1494_s4 + $0x50] sm:$0xff] }
  0xc6   : > { %536 = vmatpush.msra.mxu2 %v1012_v44  ;;  %v1028_v44 = vld [vmem:[%s1493_s3 + $0x1c8] sm:$0xff] }
  0xc7   : > { %v393_v53 = vadd.f32 %v392_v51, %v391_v50  ;;  %622 = vmatpush.msra.mxu3 %v1028_v44  ;;  %v784_v44 = vld [vmem:[%s1494_s4 + $0x48] sm:$0xff] }
  0xc8   : > { %537 = vmatpush.msra.mxu2 %v1011_v46  ;;  %v1027_v46 = vld [vmem:[%s1493_s3 + $0x1c0] sm:$0xff] }
  0xc9   : > { %v394_v55 = vrot.slane %v393_v53, 4  ;;  %623 = vmatpush.msra.mxu3 %v1027_v46  ;;  %v783_v46 = vld [vmem:[%s1494_s4 + $0x40] sm:$0xff] }
  0xca   : > { %538 = vmatpush.msra.mxu2 %v1010_v49  ;;  %v1026_v49 = vld [vmem:[%s1493_s3 + $0x1b8] sm:$0xff] }
  0xcb   : > { %v395_v57 = vadd.f32 %v394_v55, %v393_v53  ;;  %624 = vmatpush.msra.mxu3 %v1026_v49  ;;  %v782_v49 = vld [vmem:[%s1494_s4 + $0x38] sm:$0xff] }
  0xcc   : > { %539 = vmatpush.msra.mxu2 %v1009_v52  ;;  %v1025_v52 = vld [vmem:[%s1493_s3 + $0x1b0] sm:$0xff] }
  0xcd   : > { %v396_v59 = vrot.slane %v395_v57, 2  ;;  %625 = vmatpush.msra.mxu3 %v1025_v52  ;;  %v781_v52 = vld [vmem:[%s1494_s4 + $0x30] sm:$0xff] }
  0xce   : > { %540 = vmatpush.msra.mxu2 %v1008_v54  ;;  %v1024_v54 = vld [vmem:[%s1493_s3 + $0x1a8] sm:$0xff] }
  0xcf   : > { %v397_v62 = vadd.f32 %v396_v59, %v395_v57  ;;  %626 = vmatpush.msra.mxu3 %v1024_v54  ;;  %v780_v54 = vld [vmem:[%s1494_s4 + $0x28] sm:$0xff] }
  0xd0   : > { %541 = vmatpush.msra.mxu2 %v1007_v56  ;;  %v1023_v56 = vld [vmem:[%s1493_s3 + $0x1a0] sm:$0xff] }
  0xd1   : > { %v398_v0 = vrot.slane %v397_v62, 1  ;;  %627 = vmatpush.msra.mxu3 %v1023_v56  ;;  %v779_v56 = vld [vmem:[%s1494_s4 + $0x20] sm:$0xff] }
  0xd2   : > { %542 = vmatpush.msra.mxu2 %v1006_v58  ;;  %v1022_v58 = vld [vmem:[%s1493_s3 + $0x198] sm:$0xff] }
  0xd3   : > { %v399_v1 = vadd.f32 %v398_v0, %v397_v62  ;;  %628 = vmatpush.msra.mxu3 %v1022_v58  ;;  %v778_v58 = vld [vmem:[%s1494_s4 + $0x18] sm:$0xff] }
  0xd4   : > { %543 = vmatpush.msra.mxu2 %v1005_v60  ;;  %v1021_v60 = vld [vmem:[%s1493_s3 + $0x190] sm:$0xff] }
  0xd5   : > { %v400_v2 = vmul.f32 %v399_v1, %v1217_v41  ;;  %629 = vmatpush.msra.mxu3 %v1021_v60  ;;  %v777_v60 = vld [vmem:[%s1494_s4 + $0x10] sm:$0xff] }
  0xd6   : > { %544 = vmatpush.msra.mxu2 %v1004_v61  ;;  %v1020_v61 = vld [vmem:[%s1493_s3 + $0x188] sm:$0xff] }
  0xd7   : > { %v401_v3 = vadd.f32 1e-05, %v400_v2  ;;  %630 = vmatpush.msra.mxu3 %v1020_v61  ;;  %v776_v61 = vld [vmem:[%s1494_s4 + $0x8] sm:$0xff] }
  0xd8   : > { %545 = vmatpush.msra.mxu2 %v1003_v63  ;;  %v1019_v63 = vld [vmem:[%s1493_s3 + $0x180] sm:$0xff] }
  0xd9   : > { %1070 = vrsqrt.f32 %v401_v3  ;;  %vm408_vm2 = vweird.f32 %v401_v3  ;;  %631 = vmatpush.msra.mxu3 %v1019_v63  ;;  %v775_v63 = vld [vmem:[%s1494_s4] sm:$0xff] }
  0xdb   : > { %831 = vmatpush.msrb.mxu3 %v790_v31 }
  0xdd   : > { %832 = vmatpush.msrb.mxu3 %v789_v33 }
  0xdf   : > { %v1071_v4 = vpop.eup %1070  ;;  %833 = vmatpush.msrb.mxu3 %v788_v35 }
  0xe0   : > { %v403_v5 = vmul.f32 %v1071_v4, %v401_v3  ;;  %vm409_vm1 = vweird.f32 %v1071_v4 }
  0xe1   : > { %vm410_vm3 = vmor %vm408_vm2, %vm409_vm1  ;;  %834 = vmatpush.msrb.mxu3 %v787_v37 }
  0xe2   : > { %v404_v6 = vmul.f32 %v1071_v4, %v403_v5 }
  0xe3   : > { %835 = vmatpush.msrb.mxu3 %v786_v39 }
  0xe4   : > { %v405_v7 = vmul.f32 0.5, %v404_v6 }
  0xe5   : > { %836 = vmatpush.msrb.mxu3 %v785_v42 }
  0xe6   : > { %v406_v9 = vsub.f32 1.5, %v405_v7 }
  0xe7   : > { %837 = vmatpush.msrb.mxu3 %v784_v44 }
  0xe8   : > { %v407_v10 = vmul.f32 %v1071_v4, %v406_v9 }
  0xe9   : > { %838 = vmatpush.msrb.mxu3 %v783_v46 }
  0xea   : > { %v411_v12 = vsel %vm410_vm3, %v1071_v4, %v407_v10 }
  0xeb   : > { %v412_v13 = vmul.f32 %v411_v12, %v389_v47  ;;  %v413_v14 = vmul.f32 %v411_v12, %v390_v48  ;;  %839 = vmatpush.msrb.mxu3 %v782_v49 }
  0xed   : > { %v415_v16 = vmul.f32 %v414_v11, %v412_v13  ;;  %v416_v17 = vmul.f32 %v414_v11, %v413_v14  ;;  %v500_v11 = vperm.slane %v1258_v8, 1  ;;  %840 = vmatpush.msrb.mxu3 %v781_v52 }
  0xef   : > { %v418_v18 = vadd.f32 %v417_v15, %v415_v16  ;;  %v419_v22 = vadd.f32 %v417_v15, %v416_v17  ;;  %v503_v15 = vperm.slane %v1258_v8, 5  ;;  %841 = vmatpush.msrb.mxu3 %v780_v54 }
  0xf1   : > { %vm420_vm4 = vcmp.ge.f32.partialorder %v418_v18, 0.0  ;;  %v422_v19 = vmul.f32 0.2, %v418_v18  ;;  %v423_v23 = vmul.f32 0.2, %v419_v22  ;;  %vm421_vm5 = vcmp.ge.f32.partialorder %v419_v22, 0.0  ;;  %842 = vmatpush.msrb.mxu3 %v779_v56 }
  0xf2   : > { %v1050_v56 = vld [vmem:[%s1494_s4 + $0xf0] sm:$0xff] }
  0xf3   : > { %v424_v21 = vsel %vm420_vm4, %v418_v18, %v422_v19  ;;  %v425_v24 = vsel %vm421_vm5, %v419_v22, %v423_v23  ;;  %843 = vmatpush.msrb.mxu3 %v778_v58  ;;  %vm703_vm5 = vcmask 130048   ;;  %v1048_v58 = vld [vmem:[%s1494_s4 + $0xe0] sm:$0xff] }
  0xf4   : > { %460 = vmatmul.f32.vlgmr.msra.gmra.mxu1 %v424_v21 }
  0xf5   : > { %844 = vmatpush.msrb.mxu3 %v777_v60  ;;  %v1046_v60 = vld [vmem:[%s1494_s4 + $0xd0] sm:$0xff] }
  0xf7   : > { %845 = vmatpush.msrb.mxu3 %v776_v61  ;;  %v1045_v61 = vld [vmem:[%s1494_s4 + $0xc8] sm:$0xff] }
  0xf9   : > { %846 = vmatpush.msrb.mxu3 %v775_v63  ;;  %v1043_v63 = vld [vmem:[%s1494_s4 + $0xb8] sm:$0xff] }
  0xfc   : > { %463 = vmatmul.f32.gmra.mxu1 %v425_v24 }
 0x171   : > { %v461_v25 = vpop.f32.mrf.mxu1 }
 0x172   : > { %v462_v28 = vadd.f32 %v461_v25, %v443_v26 }
 0x179   : > { %v464_v27 = vpop.f32.mrf.mxu1 }
 0x17a   : > { %v465_v29 = vadd.f32 %v464_v27, %v443_v26  ;;  %v529_v26 = vperm.slane %v1199_v20, 2 }
 0x17c   : > { %v467_v30 = vadd.f32 %v465_v29, %v462_v28 }
 0x17e   : > { %v468_v32 = vrot.slane %v467_v30, 4 }
 0x180   : > { %v469_v34 = vadd.f32 %v468_v32, %v467_v30 }
 0x182   : > { %v470_v36 = vrot.slane %v469_v34, 2 }
 0x184   : > { %v471_v38 = vadd.f32 %v470_v36, %v469_v34 }
 0x186   : > { %v472_v40 = vrot.slane %v471_v38, 1 }
 0x188   : > { %v473_v43 = vadd.f32 %v472_v40, %v471_v38 }
 0x18a   : > { %v474_v45 = vmul.f32 %v473_v43, %v1217_v41 }
 0x18c   : > { %v475_v47 = vsub.f32 %v462_v28, %v474_v45  ;;  %v476_v48 = vsub.f32 %v465_v29, %v474_v45 }
 0x18e   : > { %v477_v50 = vmul.f32 %v475_v47, %v475_v47  ;;  %v478_v51 = vmul.f32 %v476_v48, %v476_v48 }
 0x190   : > { %v479_v53 = vadd.f32 %v478_v51, %v477_v50 }
 0x192   : > { %v480_v55 = vrot.slane %v479_v53, 4 }
 0x194   : > { %v481_v57 = vadd.f32 %v480_v55, %v479_v53 }
 0x196   : > { %v482_v59 = vrot.slane %v481_v57, 2 }
 0x198   : > { %v483_v62 = vadd.f32 %v482_v59, %v481_v57 }
 0x19a   : > { %v484_v0 = vrot.slane %v483_v62, 1 }
 0x19c   : > { %v485_v1 = vadd.f32 %v484_v0, %v483_v62 }
 0x19e   : > { %v486_v2 = vmul.f32 %v485_v1, %v1217_v41 }
 0x1a0   : > { %v487_v3 = vadd.f32 1e-05, %v486_v2 }
 0x1a2   : > { %1072 = vrsqrt.f32 %v487_v3  ;;  %vm494_vm7 = vweird.f32 %v487_v3 }
 0x1a8   : > { %v1073_v4 = vpop.eup %1072 }
 0x1a9   : > { %v489_v5 = vmul.f32 %v1073_v4, %v487_v3  ;;  %vm495_vm6 = vweird.f32 %v1073_v4 }
 0x1aa   : > { %vm496_vm8 = vmor %vm494_vm7, %vm495_vm6 }
 0x1ab   : > { %v490_v6 = vmul.f32 %v1073_v4, %v489_v5 }
 0x1ad   : > { %v491_v7 = vmul.f32 0.5, %v490_v6 }
 0x1af   : > { %v492_v9 = vsub.f32 1.5, %v491_v7 }
 0x1b1   : > { %v493_v10 = vmul.f32 %v1073_v4, %v492_v9 }
 0x1b3   : > { %v497_v12 = vsel %vm496_vm8, %v1073_v4, %v493_v10 }
 0x1b4   : > { %v498_v13 = vmul.f32 %v497_v12, %v475_v47  ;;  %v499_v14 = vmul.f32 %v497_v12, %v476_v48 }
 0x1b6   : > { %v501_v16 = vmul.f32 %v500_v11, %v498_v13  ;;  %v502_v17 = vmul.f32 %v500_v11, %v499_v14  ;;  %v586_v11 = vperm.slane %v1258_v8, 2 }
 0x1b8   : > { %v504_v18 = vadd.f32 %v503_v15, %v501_v16  ;;  %v505_v22 = vadd.f32 %v503_v15, %v502_v17  ;;  %v589_v15 = vperm.slane %v1258_v8, 6 }
 0x1ba   : > { %vm506_vm9 = vcmp.ge.f32.partialorder %v504_v18, 0.0  ;;  %v508_v19 = vmul.f32 0.2, %v504_v18  ;;  %v509_v23 = vmul.f32 0.2, %v505_v22  ;;  %vm507_vm10 = vcmp.ge.f32.partialorder %v505_v22, 0.0 }
 0x1bc   : > { %v510_v21 = vsel %vm506_vm9, %v504_v18, %v508_v19  ;;  %v511_v24 = vsel %vm507_vm10, %v505_v22, %v509_v23 }
 0x1bd   : > { %546 = vmatmul.f32.vlgmr.msra.gmra.mxu2 %v510_v21 }
 0x1c5   : > { %549 = vmatmul.f32.gmra.mxu2 %v511_v24 }
 0x240   : > { %v547_v25 = vpop.f32.mrf.mxu2 }
 0x241   : > { %v548_v28 = vadd.f32 %v547_v25, %v529_v26 }
 0x248   : > { %v550_v27 = vpop.f32.mrf.mxu2 }
 0x249   : > { %v551_v29 = vadd.f32 %v550_v27, %v529_v26  ;;  %v615_v26 = vperm.slane %v1199_v20, 3 }
 0x24b   : > { %v553_v30 = vadd.f32 %v551_v29, %v548_v28 }
 0x24d   : > { %v554_v32 = vrot.slane %v553_v30, 4 }
 0x24f   : > { %v555_v34 = vadd.f32 %v554_v32, %v553_v30 }
 0x251   : > { %v556_v36 = vrot.slane %v555_v34, 2 }
 0x253   : > { %v557_v38 = vadd.f32 %v556_v36, %v555_v34 }
 0x255   : > { %v558_v40 = vrot.slane %v557_v38, 1 }
 0x257   : > { %v559_v43 = vadd.f32 %v558_v40, %v557_v38 }
 0x259   : > { %v560_v45 = vmul.f32 %v559_v43, %v1217_v41 }
 0x25b   : > { %v561_v47 = vsub.f32 %v548_v28, %v560_v45  ;;  %v562_v48 = vsub.f32 %v551_v29, %v560_v45 }
 0x25d   : > { %v563_v50 = vmul.f32 %v561_v47, %v561_v47  ;;  %v564_v51 = vmul.f32 %v562_v48, %v562_v48 }
 0x25f   : > { %v565_v53 = vadd.f32 %v564_v51, %v563_v50 }
 0x261   : > { %v566_v55 = vrot.slane %v565_v53, 4 }
 0x263   : > { %v567_v57 = vadd.f32 %v566_v55, %v565_v53 }
 0x265   : > { %v568_v59 = vrot.slane %v567_v57, 2 }
 0x267   : > { %v569_v62 = vadd.f32 %v568_v59, %v567_v57 }
 0x269   : > { %v570_v0 = vrot.slane %v569_v62, 1 }
 0x26b   : > { %v571_v1 = vadd.f32 %v570_v0, %v569_v62 }
 0x26d   : > { %v572_v2 = vmul.f32 %v571_v1, %v1217_v41 }
 0x26f   : > { %v573_v3 = vadd.f32 1e-05, %v572_v2 }
 0x271   : > { %1074 = vrsqrt.f32 %v573_v3  ;;  %vm580_vm12 = vweird.f32 %v573_v3 }
 0x277   : > { %v1075_v4 = vpop.eup %1074 }
 0x278   : > { %v575_v5 = vmul.f32 %v1075_v4, %v573_v3  ;;  %vm581_vm11 = vweird.f32 %v1075_v4 }
 0x279   : > { %vm582_vm13 = vmor %vm580_vm12, %vm581_vm11 }
 0x27a   : > { %v576_v6 = vmul.f32 %v1075_v4, %v575_v5 }
 0x27c   : > { %v577_v7 = vmul.f32 0.5, %v576_v6 }
 0x27e   : > { %v578_v9 = vsub.f32 1.5, %v577_v7 }
 0x280   : > { %v579_v10 = vmul.f32 %v1075_v4, %v578_v9 }
 0x282   : > { %v583_v12 = vsel %vm582_vm13, %v1075_v4, %v579_v10 }
 0x283   : > { %v584_v13 = vmul.f32 %v583_v12, %v561_v47  ;;  %v585_v14 = vmul.f32 %v583_v12, %v562_v48 }
 0x285   : > { %v587_v16 = vmul.f32 %v586_v11, %v584_v13  ;;  %v588_v17 = vmul.f32 %v586_v11, %v585_v14  ;;  %v672_v11 = vperm.slane %v1258_v8, 3 }
 0x287   : > { %v590_v18 = vadd.f32 %v589_v15, %v587_v16  ;;  %v591_v22 = vadd.f32 %v589_v15, %v588_v17  ;;  %v675_v15 = vperm.slane %v1258_v8, 7  ;;  %v699_v8 = vld [vmem:[%s314_s9] sm:$0xff] }
 0x289   : > { %vm592_vm14 = vcmp.ge.f32.partialorder %v590_v18, 0.0  ;;  %v594_v19 = vmul.f32 0.2, %v590_v18  ;;  %v595_v23 = vmul.f32 0.2, %v591_v22  ;;  %vm593_vm15 = vcmp.ge.f32.partialorder %v591_v22, 0.0 }
 0x28b   : > { %v596_v21 = vsel %vm592_vm14, %v590_v18, %v594_v19  ;;  %v597_v24 = vsel %vm593_vm15, %v591_v22, %v595_v23 }
 0x28c   : > { %632 = vmatmul.f32.vlgmr.msra.gmra.mxu3 %v596_v21 }
 0x294   : > { %635 = vmatmul.f32.gmra.mxu3 %v597_v24 }
 0x30f   : > { %v633_v25 = vpop.f32.mrf.mxu3 }
 0x310   : > { %v634_v28 = vadd.f32 %v633_v25, %v615_v26 }
 0x317   : > { %v636_v27 = vpop.f32.mrf.mxu3 }
 0x318   : > { %v637_v29 = vadd.f32 %v636_v27, %v615_v26 }
 0x31a   : > { %v639_v30 = vadd.f32 %v637_v29, %v634_v28 }
 0x31c   : > { %v640_v32 = vrot.slane %v639_v30, 4 }
 0x31e   : > { %v641_v34 = vadd.f32 %v640_v32, %v639_v30 }
 0x320   : > { %v642_v36 = vrot.slane %v641_v34, 2 }
 0x322   : > { %v643_v38 = vadd.f32 %v642_v36, %v641_v34 }
 0x324   : > { %v644_v40 = vrot.slane %v643_v38, 1 }
 0x326   : > { %v645_v43 = vadd.f32 %v644_v40, %v643_v38 }
 0x328   : > { %v646_v45 = vmul.f32 %v645_v43, %v1217_v41 }
 0x32a   : > { %v647_v47 = vsub.f32 %v634_v28, %v646_v45  ;;  %v648_v48 = vsub.f32 %v637_v29, %v646_v45  ;;  %v700_v28 = vld [vmem:[%s314_s9 + $0x8] sm:$0xff] }
 0x32c   : > { %v649_v50 = vmul.f32 %v647_v47, %v647_v47  ;;  %v650_v51 = vmul.f32 %v648_v48, %v648_v48 }
 0x32e   : > { %v651_v53 = vadd.f32 %v650_v51, %v649_v50 }
 0x330   : > { %v652_v55 = vrot.slane %v651_v53, 4 }
 0x332   : > { %v653_v57 = vadd.f32 %v652_v55, %v651_v53  ;;  %v1051_v55 = vld [vmem:[%s1494_s4 + $0xf8] sm:$0xff] }
 0x333   : > { %808 = vmatpush.msrb.mxu2 %v1051_v55 }
 0x334   : > { %v654_v59 = vrot.slane %v653_v57, 2 }
 0x335   : > { %809 = vmatpush.msrb.mxu2 %v1050_v56 }
 0x336   : > { %v655_v62 = vadd.f32 %v654_v59, %v653_v57  ;;  %v1049_v57 = vld [vmem:[%s1494_s4 + $0xe8] sm:$0xff]  ;;  %v1047_v59 = vld [vmem:[%s1494_s4 + $0xd8] sm:$0xff] }
 0x337   : > { %810 = vmatpush.msrb.mxu2 %v1049_v57 }
 0x338   : > { %v656_v0 = vrot.slane %v655_v62, 1 }
 0x339   : > { %811 = vmatpush.msrb.mxu2 %v1048_v58 }
 0x33a   : > { %v657_v1 = vadd.f32 %v656_v0, %v655_v62  ;;  %v1044_v62 = vld [vmem:[%s1494_s4 + $0xc0] sm:$0xff]  ;;  %v1042_v0 = vld [vmem:[%s1494_s4 + $0xb0] sm:$0xff] }
 0x33b   : > { %812 = vmatpush.msrb.mxu2 %v1047_v59 }
 0x33c   : > { %v658_v2 = vmul.f32 %v657_v1, %v1217_v41  ;;  %v1041_v1 = vld [vmem:[%s1494_s4 + $0xa8] sm:$0xff] }
 0x33d   : > { %813 = vmatpush.msrb.mxu2 %v1046_v60 }
 0x33e   : > { %v659_v3 = vadd.f32 1e-05, %v658_v2  ;;  %v1040_v2 = vld [vmem:[%s1494_s4 + $0xa0] sm:$0xff] }
 0x33f   : > { %814 = vmatpush.msrb.mxu2 %v1045_v61 }
 0x340   : > { %1076 = vrsqrt.f32 %v659_v3  ;;  %vm666_vm1 = vweird.f32 %v659_v3 }
 0x341   : > { %815 = vmatpush.msrb.mxu2 %v1044_v62 }
 0x343   : > { %816 = vmatpush.msrb.mxu2 %v1043_v63 }
 0x345   : > { %817 = vmatpush.msrb.mxu2 %v1042_v0 }
 0x346   : > { %v1077_v4 = vpop.eup %1076 }
 0x347   : > { %v661_v5 = vmul.f32 %v1077_v4, %v659_v3  ;;  %vm667_vm0 = vweird.f32 %v1077_v4  ;;  %818 = vmatpush.msrb.mxu2 %v1041_v1  ;;  %v1039_v3 = vld [vmem:[%s1494_s4 + $0x98] sm:$0xff] }
 0x348   : > { %vm668_vm2 = vmor %vm666_vm1, %vm667_vm0 }
 0x349   : > { %v662_v6 = vmul.f32 %v1077_v4, %v661_v5  ;;  %819 = vmatpush.msrb.mxu2 %v1040_v2  ;;  %v1038_v5 = vld [vmem:[%s1494_s4 + $0x90] sm:$0xff] }
 0x34b   : > { %v663_v7 = vmul.f32 0.5, %v662_v6  ;;  %820 = vmatpush.msrb.mxu2 %v1039_v3  ;;  %v1037_v6 = vld [vmem:[%s1494_s4 + $0x88] sm:$0xff] }
 0x34d   : > { %v664_v9 = vsub.f32 1.5, %v663_v7  ;;  %821 = vmatpush.msrb.mxu2 %v1038_v5  ;;  %v1036_v7 = vld [vmem:[%s1494_s4 + $0x80] sm:$0xff] }
 0x34f   : > { %v665_v10 = vmul.f32 %v1077_v4, %v664_v9  ;;  %822 = vmatpush.msrb.mxu2 %v1037_v6 }
 0x351   : > { %v669_v12 = vsel %vm668_vm2, %v1077_v4, %v665_v10  ;;  %823 = vmatpush.msrb.mxu2 %v1036_v7 }
 0x352   : > { %v670_v13 = vmul.f32 %v669_v12, %v647_v47  ;;  %v671_v14 = vmul.f32 %v669_v12, %v648_v48 }
 0x354   : > { %v674_v41 = vmul.f32 %v672_v11, %v671_v14  ;;  %v673_v16 = vmul.f32 %v672_v11, %v670_v13 }
 0x356   : > { %v676_v17 = vadd.f32 %v675_v15, %v673_v16  ;;  %v677_v18 = vadd.f32 %v675_v15, %v674_v41  ;;  %v854_v41 = vperm.slane %v1199_v20, 4 }
 0x358   : > { %vm678_vm3 = vcmp.ge.f32.partialorder %v676_v17, 0.0  ;;  %v680_v19 = vmul.f32 0.2, %v676_v17  ;;  %vm679_vm4 = vcmp.ge.f32.partialorder %v677_v18, 0.0  ;;  %v681_v21 = vmul.f32 0.2, %v677_v18 }
 0x35a   : > { %v682_v22 = vsel %vm678_vm3, %v676_v17, %v680_v19  ;;  %v683_v23 = vsel %vm679_vm4, %v677_v18, %v681_v21 }
 0x35b   : > { %847 = vmatmul.f32.vlgmr.msrb.gmra.mxu3 %v682_v22  ;;  %v684_v24 = vpack.c.bf16 %v683_v23, %v682_v22 }
 0x35d   : > { %692 = vmatpush.bf16.xpose.msrb.mxu0 %v684_v24 }
 0x363   : > { %850 = vmatmul.f32.gmra.mxu3 %v683_v23 }
 0x364   : > { %693 = vmatmul.bf16.vlgmr.msrb.gmra.mxu0 %v684_v24 }
 0x3de   : > { %v848_v15 = vpop.f32.mrf.mxu3 }
 0x3e1   : > { %v694_v25 = vpop.f32.mrf.mxu0 }
 0x3e2   : > { %v701_v26 = vmul.f32 %v699_v8, %v694_v25 }
 0x3e4   : > { %859 = vst.msk [vmem:[%s328_s12] sm:$0xff] %vm703_vm5, %v701_v26  ;;  %v704_v27 = vsel %vm703_vm5, %v701_v26, 0.0 }
 0x3e5   : > { %705 = vadd.xlane.f32.xlu0 %v704_v27 }
 0x3e6   : > { %v851_v19 = vpop.f32.mrf.mxu3 }
 0x3e9   : > { %v696_v29 = vpop.f32.mrf.mxu0 }
 0x3ea   : > { %v702_v30 = vmul.f32 %v700_v28, %v696_v29 }
 0x3ec   : > { %860 = vst.msk [vmem:[%s328_s12 + $0x8] sm:$0xff] %vm703_vm5, %v702_v30  ;;  %v707_v31 = vsel %vm703_vm5, %v702_v30, 0.0  ;;  %v737_v32 = vpack.c.bf16 %v702_v30, %v701_v26 }
 0x3ed   : > { %708 = vadd.xlane.f32.xlu0 %v707_v31 }
 0x3ee   : > { %738 = vxpose.xlu1.c.b16.start.end [1/1] (short) (narrow) %v737_v32, 16 }
 0x458   : > { %v706_v33 = vpop.xlane.xlu0 %705 }
 0x459   : > { %1078 = vrsqrt.f32 %v706_v33  ;;  %vm718_vm7 = vweird.f32 %v706_v33  ;;  %vm710_vm11 = vcmp.gt.f32.partialorder %v706_v33, 0.0 }
 0x45f   : > { %v1079_v34 = vpop.eup %1078 }
 0x460   : > { %v713_v35 = vmul.f32 %v1079_v34, %v706_v33  ;;  %v709_v36 = vpop.xlane.xlu0 %708  ;;  %vm719_vm6 = vweird.f32 %v1079_v34 }
 0x461   : > { %1080 = vrsqrt.f32 %v709_v36  ;;  %vm720_vm8 = vmor %vm718_vm7, %vm719_vm6  ;;  %vm728_vm10 = vweird.f32 %v709_v36  ;;  %vm711_vm13 = vcmp.gt.f32.partialorder %v709_v36, 0.0 }
 0x462   : > { %v714_v37 = vmul.f32 %v1079_v34, %v713_v35 }
 0x464   : > { %v715_v38 = vmul.f32 0.5, %v714_v37 }
 0x466   : > { %v716_v39 = vsub.f32 1.5, %v715_v38 }
 0x467   : > { %v1081_v40 = vpop.eup %1080 }
 0x468   : > { %v723_v42 = vmul.f32 %v1081_v40, %v709_v36  ;;  %v717_v44 = vmul.f32 %v1079_v34, %v716_v39  ;;  %vm729_vm9 = vweird.f32 %v1081_v40 }
 0x469   : > { %vm730_vm12 = vmor %vm728_vm10, %vm729_vm9 }
 0x46a   : > { %v724_v43 = vmul.f32 %v1081_v40, %v723_v42  ;;  %v721_v47 = vsel %vm720_vm8, %v1079_v34, %v717_v44 }
 0x46b   : > { %v732_v49 = vsel %vm710_vm11, %v721_v47, 0.0 }
 0x46c   : > { %v725_v45 = vmul.f32 0.5, %v724_v43  ;;  %v734_v52 = vmul.f32 %v732_v49, %v682_v22 }
 0x46e   : > { %v726_v46 = vsub.f32 1.5, %v725_v45 }
 0x470   : > { %v727_v48 = vmul.f32 %v1081_v40, %v726_v46 }
 0x472   : > { %v731_v50 = vsel %vm730_vm12, %v1081_v40, %v727_v48 }
 0x473   : > { %v733_v51 = vsel %vm711_vm13, %v731_v50, 0.0 }
 0x474   : > { %v735_v53 = vmul.f32 %v733_v51, %v683_v23 }
 0x476   : > { %v736_v54 = vpack.c.bf16 %v735_v53, %v734_v52 }
 0x478   : > { %764 = vmatpush.bf16.msrb.mxu1 %v736_v54 }
 0x49a   : > { %v746_v4 = vpop.trf.xlu1 }
 0x49b   : > { %1035 = vmatmul.msk.bf16.vlgmr.msrb.gmra.mxu1 %vm703_vm5, %v746_v4 }
 0x518   : > { %v766_v9 = vpop.f32.mrf.mxu1 }
 0x519   : > { %v771_v10 = vmul.f32 %v766_v9, %v732_v49 }
 0x51b   : > { %v773_v11 = vsub.f32 0.0, %v771_v10 }
 0x51d   : > { %824 = vmatmul.f32.vlgmr.msrb.gmra.mxu2 %v773_v11 }
 0x520   : > { %v768_v12 = vpop.f32.mrf.mxu1 }
 0x521   : > { %v772_v13 = vmul.f32 %v768_v12, %v733_v51 }
 0x523   : > { %v774_v14 = vsub.f32 0.0, %v772_v13 }
 0x525   : > { %827 = vmatmul.f32.gmra.mxu2 %v774_v14 }
 0x5a0   : > { %v825_v16 = vpop.f32.mrf.mxu2 }
 0x5a1   : > { %v849_v17 = vadd.f32 %v848_v15, %v825_v16 }
 0x5a3   : > { %v855_v18 = vadd.f32 %v854_v41, %v849_v17 }
 0x5a5   : > { %857 = vst [vmem:[%s323_s27] sm:$0xff] %v855_v18 }
 0x5a8   : > { %v828_v21 = vpop.f32.mrf.mxu2 }
 0x5a9   : > { %v852_v22 = vadd.f32 %v851_v19, %v828_v21 }
 0x5ab   : > { %v856_v23 = vadd.f32 %v854_v41, %v852_v22 }
 0x5ad   : > { %858 = vst [vmem:[%s323_s27 + $0x8] sm:$0xff] %v856_v23 }
 0x5ae PF: > { %s18_s24 = sadd.s32 1, %s1088_s24  }
 0x5af   : > { %p15_p4 = scmp.ge.s32.totalorder %s18_s24, 4  }
 0x5b1   :  { %17 = sbr.rel (!%p15_p4) target bundleno = 1 (0x1), region = 96 }

</bundles_post_ra>
